<compile_context>
chip_gen: v7x
topology: tpu7x:2x2x1
jax: 0.10.0
libtpu: 0.0.40
codegen_flags: <defaults>
</compile_context>

<pallas_src>
import jax
import jax.numpy as jnp
from jax.experimental import pallas as pl
from jax.experimental.pallas import tpu as pltpu


def f0_encoder_kernel(x_ref, w1_ref, b1_ref, w2_ref, b2_ref, o_ref):
    # x_ref:  (1, tT)   one time tile of f0 (batch dim squeezed), f32
    # w1_ref: (D, 1)    c1 weight as a column (channels on sublanes), compute dtype
    # b1_ref: (D, 1)    c1 bias, compute dtype
    # w2_ref: (D, D)    c2 weight, bf16 (out = w2 @ h)
    # b2_ref: (D, 1)    c2 bias, f32
    # o_ref:  (D, tT)   output tile (batch dim squeezed)
    x = x_ref[...].astype(w1_ref.dtype)                     # cast once per tile
    # c1 (pointwise) + sin: broadcast over lanes (VPU / EUP path).
    h = jnp.sin(w1_ref[...] * x + b1_ref[...])              # (D, tT)
    # c2 (pointwise) as a bf16 MXU matmul with f32 accumulation.
    out = jnp.dot(w2_ref[...], h.astype(w2_ref.dtype),
                  preferred_element_type=jnp.float32)       # (D, tT) f32
    o_ref[...] = (out + b2_ref[...]).astype(o_ref.dtype)


def _is_newgen_tpu():
    """True for TPU generations with a bf16 VPU (v6e / v7x)."""
    try:
        kind = jax.devices()[0].device_kind.lower()
    except Exception:
        return False
    return ("v6" in kind) or ("v7" in kind) or ("7x" in kind)


def f0_encoder(x, w1, b1, w2, b2, *, tT=None, compute_dtype=None, out_dtype=None):
    """x: (B, 1, T) float32.  Returns (B, D, T) in `out_dtype` (NCL, like PyTorch).

    tT:            time tile (multiple of 128); default 2048 on v6e/v7x, 1024 otherwise.
    compute_dtype: dtype for the c1 affine + sin; default bf16 on v6e/v7x, f32 otherwise.
    out_dtype:     output dtype; default x.dtype (f32).  Pass bf16 if downstream
                   consumers allow it to halve HBM writeback.
    """
    B, C_in, T = x.shape
    assert C_in == 1
    D = w1.shape[0]

    newgen = _is_newgen_tpu()
    if compute_dtype is None:
        compute_dtype = jnp.bfloat16 if newgen else jnp.float32
    if out_dtype is None:
        out_dtype = x.dtype
    if tT is None:
        tT = 2048 if newgen else 1024
    # Keep the tile a multiple of 128 lanes and no larger than round_up(T, 128);
    # the grid does NOT require T % tT == 0 (boundary block is masked on store).
    tT = max(128, min(int(tT), pl.cdiv(T, 128) * 128))
    grid = (B, pl.cdiv(T, tT))   # on v7x, B * ceil(T/tT) tiles split across 2 TCs

    w1_col = w1.reshape(D, 1).astype(compute_dtype)
    b1_col = b1.reshape(D, 1).astype(compute_dtype)
    w2_mat = w2.reshape(D, D).astype(jnp.bfloat16)   # out = w2 @ h on the MXU
    b2_col = b2.reshape(D, 1).astype(jnp.float32)

    return pl.pallas_call(
        f0_encoder_kernel,
        out_shape=jax.ShapeDtypeStruct((B, D, T), out_dtype),
        grid_spec=pltpu.PrefetchScalarGridSpec(
            num_scalar_prefetch=0,
            grid=grid,
            in_specs=[
                # x tile: batch squeezed, channel dim (=1) kept, time on lanes.
                pl.BlockSpec((None, 1, tT), lambda b, t: (b, 0, t)),
                pl.BlockSpec((D, 1), lambda b, t: (0, 0)),   # w1 (resident)
                pl.BlockSpec((D, 1), lambda b, t: (0, 0)),   # b1
                pl.BlockSpec((D, D), lambda b, t: (0, 0)),   # w2 (bf16)
                pl.BlockSpec((D, 1), lambda b, t: (0, 0)),   # b2
            ],
            # Lane-dense (D, tT) tiles written straight into the NCL output.
            out_specs=pl.BlockSpec((None, D, tT), lambda b, t: (b, 0, t)),
        ),
        compiler_params=pltpu.CompilerParams(
            dimension_semantics=("parallel", "parallel")),
    )(x, w1_col, b1_col, w2_mat, b2_col)


def f0_encoder_ref(x, w1, b1, w2, b2):
    """Pure-JAX f32 reference matching the PyTorch forward."""
    D = w1.shape[0]
    h = jnp.sin(jnp.einsum("bct,dc->bdt", x, w1.reshape(D, 1)) + b1[None, :, None])
    out = jnp.einsum("bkt,dk->bdt", h, w2.reshape(D, D)) + b2[None, :, None]
    return out


if __name__ == "__main__":
    key = jax.random.PRNGKey(0)
    kx, k1w, k1b, k2w, k2b = jax.random.split(key, 5)

    # Small test shapes (module default is D=512); T=200 is NOT a multiple of
    # 128, so every call below exercises the masked boundary-block path.
    B, T, D = 2, 200, 128

    x = jax.random.normal(kx, (B, 1, T), dtype=jnp.float32)

    # Synthetic parameters mirroring the PyTorch __init__ shapes:
    # c1.weight ~ N(0, 0.3) of shape (D, 1, 1); other params uniform init.
    w1 = 0.3 * jax.random.normal(k1w, (D, 1, 1), dtype=jnp.float32)
    b1 = jax.random.uniform(k1b, (D,), minval=-1.0, maxval=1.0, dtype=jnp.float32)
    bound2 = 1.0 / (D ** 0.5)
    w2 = jax.random.uniform(k2w, (D, D, 1), minval=-bound2, maxval=bound2,
                            dtype=jnp.float32)
    b2 = jax.random.uniform(k2b, (D,), minval=-bound2, maxval=bound2,
                            dtype=jnp.float32)

    ref = f0_encoder_ref(x, w1, b1, w2, b2)

    # 1) f32 affine/sin, bf16 MXU matmul, f32 out, small tile -> two time tiles,
    #    the second one partial (masked writeback, no pad/slice epilogue).
    out = jax.block_until_ready(
        f0_encoder(x, w1, b1, w2, b2, tT=128, compute_dtype=jnp.float32))
    assert out.shape == (B, D, T) and out.dtype == jnp.float32, (out.shape, out.dtype)
    assert jnp.allclose(out, ref, atol=2e-2, rtol=2e-2), \
        float(jnp.max(jnp.abs(out - ref)))

    # 2) Default (per-generation) tile, clamped here to 256 -> a single partial
    #    block larger than T, still with the safe f32 compute path.
    out_big = jax.block_until_ready(
        f0_encoder(x, w1, b1, w2, b2, compute_dtype=jnp.float32))
    assert out_big.shape == (B, D, T)
    assert jnp.allclose(out_big, ref, atol=2e-2, rtol=2e-2), \
        float(jnp.max(jnp.abs(out_big - ref)))

    # 3) Production perf path: auto compute dtype (bf16 affine/sin on v6e/v7x)
    #    and bf16 output writeback.  Best-effort: skipped silently if this
    #    chip's Mosaic lowering rejects bf16 sin; accuracy failures still raise.
    out_bf16 = None
    try:
        out_bf16 = jax.block_until_ready(
            f0_encoder(x, w1, b1, w2, b2, out_dtype=jnp.bfloat16))
    except Exception:
        out_bf16 = None  # TODO(synk): bf16-compute path unsupported on this chip.
    if out_bf16 is not None:
        assert out_bf16.shape == (B, D, T) and out_bf16.dtype == jnp.bfloat16
        assert jnp.allclose(out_bf16.astype(jnp.float32), ref, atol=6e-2, rtol=6e-2), \
            float(jnp.max(jnp.abs(out_bf16.astype(jnp.float32) - ref)))

    print("KERNEL_OK")
</pallas_src>

<mosaic_0001>
module attributes {stable_mosaic.version = 11 : i64} {
  func.func @f0_encoder_kernel(%arg0: i32, %arg1: i32, %arg2: memref<1x1x128xf32, #tpu.memory_space<vmem>>, %arg3: memref<128x1xf32, #tpu.memory_space<vmem>>, %arg4: memref<128x1xf32, #tpu.memory_space<vmem>>, %arg5: memref<128x128xbf16, #tpu.memory_space<vmem>>, %arg6: memref<128x1xf32, #tpu.memory_space<vmem>>, %arg7: memref<1x128x128xf32, #tpu.memory_space<vmem>>) attributes {dimension_semantics = [#tpu.dimension_semantics<parallel>, #tpu.dimension_semantics<parallel>], iteration_bounds = array<i64: 2, 2>, scalar_prefetch = 0 : i64, scratch_operands = 0 : i64, tpu.core_type = #tpu.core_type<tc>, window_params = [{transform_indices = @transform_0, window_bounds = array<i64: 1, 1, 128>}, {pipeline_mode = #tpu.pipeline_mode<synchronous>, transform_indices = @transform_1, window_bounds = array<i64: 128, 1>}, {pipeline_mode = #tpu.pipeline_mode<synchronous>, transform_indices = @transform_2, window_bounds = array<i64: 128, 1>}, {pipeline_mode = #tpu.pipeline_mode<synchronous>, transform_indices = @transform_3, window_bounds = array<i64: 128, 128>}, {pipeline_mode = #tpu.pipeline_mode<synchronous>, transform_indices = @transform_4, window_bounds = array<i64: 128, 1>}, {transform_indices = @transform_5, window_bounds = array<i64: 1, 128, 128>}]} {
    %c0 = arith.constant 0 : index
    %c0_0 = arith.constant 0 : index
    %c0_1 = arith.constant 0 : index
    %0 = vector.load %arg2[%c0, %c0_0, %c0_1] : memref<1x1x128xf32, #tpu.memory_space<vmem>>, vector<1x1x128xf32>
    %1 = vector.shape_cast %0 : vector<1x1x128xf32> to vector<1x128xf32>
    %c0_2 = arith.constant 0 : index
    %c0_3 = arith.constant 0 : index
    %2 = vector.load %arg3[%c0_2, %c0_3] : memref<128x1xf32, #tpu.memory_space<vmem>>, vector<128x1xf32>
    %3 = vector.broadcast %2 : vector<128x1xf32> to vector<128x128xf32>
    %4 = vector.broadcast %1 : vector<1x128xf32> to vector<128x128xf32>
    %5 = arith.mulf %3, %4 : vector<128x128xf32>
    %c0_4 = arith.constant 0 : index
    %c0_5 = arith.constant 0 : index
    %6 = vector.load %arg4[%c0_4, %c0_5] : memref<128x1xf32, #tpu.memory_space<vmem>>, vector<128x1xf32>
    %7 = vector.broadcast %6 : vector<128x1xf32> to vector<128x128xf32>
    %8 = arith.addf %5, %7 : vector<128x128xf32>
    %9 = math.sin %8 : vector<128x128xf32>
    %c0_6 = arith.constant 0 : index
    %c0_7 = arith.constant 0 : index
    %10 = vector.load %arg5[%c0_6, %c0_7] : memref<128x128xbf16, #tpu.memory_space<vmem>>, vector<128x128xbf16>
    %11 = arith.truncf %9 : vector<128x128xf32> to vector<128x128xbf16>
    %cst = arith.constant dense<0.000000e+00> : vector<128x128xf32>
    %12 = tpu.matmul %10, %11, %cst {dimension_numbers = #tpu.dot_dimension_numbers<[1], [0], [0], [1], [0, 0, 1, 1], [], []>} : vector<128x128xbf16>, vector<128x128xbf16>, vector<128x128xf32> -> vector<128x128xf32>
    %c0_8 = arith.constant 0 : index
    %c0_9 = arith.constant 0 : index
    %13 = vector.load %arg6[%c0_8, %c0_9] : memref<128x1xf32, #tpu.memory_space<vmem>>, vector<128x1xf32>
    %14 = vector.broadcast %13 : vector<128x1xf32> to vector<128x128xf32>
    %15 = arith.addf %12, %14 : vector<128x128xf32>
    %c0_10 = arith.constant 0 : index
    %c0_11 = arith.constant 0 : index
    %c0_12 = arith.constant 0 : index
    %16 = vector.load %arg7[%c0_10, %c0_11, %c0_12] : memref<1x128x128xf32, #tpu.memory_space<vmem>>, vector<1x128x128xf32>
    %17 = vector.shape_cast %16 : vector<1x128x128xf32> to vector<128x128xf32>
    %18 = vector.shape_cast %15 : vector<128x128xf32> to vector<1x128x128xf32>
    tpu.vector_store %arg7[%c0_10, %c0_11, %c0_12], %18 {strides = array<i32>} : memref<1x128x128xf32, #tpu.memory_space<vmem>>, vector<1x128x128xf32>,
    return
  }
  func.func @transform_0(%arg0: i32, %arg1: i32) -> (i32, i32, i32) {
    %c0_i32 = arith.constant 0 : i32
    %c0_i32_0 = arith.constant 0 : i32
    return %arg0, %c0_i32, %arg1 : i32, i32, i32
  }
  func.func @transform_1(%arg0: i32, %arg1: i32) -> (i32, i32) {
    %c0_i32 = arith.constant 0 : i32
    %c0_i32_0 = arith.constant 0 : i32
    %c0_i32_1 = arith.constant 0 : i32
    return %c0_i32, %c0_i32_0 : i32, i32
  }
  func.func @transform_2(%arg0: i32, %arg1: i32) -> (i32, i32) {
    %c0_i32 = arith.constant 0 : i32
    %c0_i32_0 = arith.constant 0 : i32
    %c0_i32_1 = arith.constant 0 : i32
    return %c0_i32, %c0_i32_0 : i32, i32
  }
  func.func @transform_3(%arg0: i32, %arg1: i32) -> (i32, i32) {
    %c0_i32 = arith.constant 0 : i32
    %c0_i32_0 = arith.constant 0 : i32
    %c0_i32_1 = arith.constant 0 : i32
    return %c0_i32, %c0_i32_0 : i32, i32
  }
  func.func @transform_4(%arg0: i32, %arg1: i32) -> (i32, i32) {
    %c0_i32 = arith.constant 0 : i32
    %c0_i32_0 = arith.constant 0 : i32
    %c0_i32_1 = arith.constant 0 : i32
    return %c0_i32, %c0_i32_0 : i32, i32
  }
  func.func @transform_5(%arg0: i32, %arg1: i32) -> (i32, i32, i32) {
    %c0_i32 = arith.constant 0 : i32
    %c0_i32_0 = arith.constant 0 : i32
    return %arg0, %c0_i32, %arg1 : i32, i32, i32
  }
}

</mosaic_0001>

<bundles_post_ra>
// kernel: tpu_custom_call.1
= control target key start
LH: loop header
LB: loop body
LE: loop exit
PB: predicated region body
PF: predicated region fallthrough
CT: control target
= control target key end

     0   :  { %s3032_s18 = smov 0   ;;  %s3034_s19 = smov 0   ;;  %s4749_s0 = inlined_call_operand.vmem [shape: f32[2,1,200], index: 0, kind: input, shape index: {}]   ;;  %s4750_s1 = inlined_call_operand.vmem [shape: f32[128,1], index: 1, kind: input, shape index: {}]   ;;  %s4751_s2 = inlined_call_operand.vmem [shape: f32[128,1], index: 2, kind: input, shape index: {}]   ;;  %s4752_s3 = inlined_call_operand.vmem [shape: bf16[128,128], index: 3, kind: input, shape index: {}]   ;;  %s4753_s4 = inlined_call_operand.vmem [shape: f32[128,1], index: 4, kind: input, shape index: {}]   ;;  %s4754_s5 = inlined_call_operand.vmem [shape: f32[2,128,200], index: 5, kind: output, shape index: {}]  }
   0x1   :  { %s3036_s20 = smov 0   ;;  %s3038_s21 = smov 0  }
   0x2   :  { %s3040_s22 = smov 0   ;;  %s3042_s23 = smov 0  }
   0x3   :  { %s3044_s24 = smov 0  }
   0x4 LB: > { %s24_s25 = sadd.s32 1, %s2985_s22  ;;  %s27_s26 = sadd.s32 1, %s2989_s23  ;;  %s2993_s24 = sphi %s3044_s24, %s15_s24   ;;  %s2989_s23 = sphi %s3042_s23, %s4912_s23   ;;  %s2985_s22 = sphi %s3040_s22, %s4911_s22   ;;  %s2981_s21 = sphi %s3038_s21, %s4910_s21   ;;  %s2977_s20 = sphi %s3036_s20, %s4909_s20   ;;  %s2973_s19 = sphi %s3034_s19, %s4908_s19   ;;  %s2969_s18 = sphi %s3032_s18, %s4907_s18  }
   0x5   : > { %p25_p0 = scmp.ge.s32.totalorder %s24_s25, 2  ;;  %s2588_s27 = sadd.s32 4294967295, %s2993_s24  }
   0x6   : > { %p158_p1 = scmp.ne.s32.totalorder %s2973_s19, %s2969_s18  ;;  %p159_p2 = scmp.eq.s32.totalorder %s2588_s27, 3 }
   0x7   : > { %s4914_s25 = smov (%p25_p0, %s24_s25), 0  ;;  %s4916_s26 = smov (!%p25_p0, %s27_s26), %s2989_s23 }
   0x8   : > { %s144_s28 = ssub.s32 %s2985_s22, %s4914_s25  ;;  %p29_p3 = scmp.ge.s32.totalorder %s4916_s26, 2 }
   0x9   : > { %p2592_p4 = scmp.ge.s32.totalorder %s2993_s24, 1  ;;  %p3078_p5 = por %p159_p2, %p158_p1 }
   0xa   : > { %p205_p6 = scmp.lt.s32.totalorder %s2993_s24, 5  ;;  %s4918_s26 = smov (%p29_p3, %s4916_s26), 0 }
   0xb   : > { %s143_s30 = ssub.s32 %s2989_s23, %s4918_s26  ;;  %s148_s7 = sadd.s32 1, %s2973_s19 }
   0xc   : > { %p206_p7 = pnand %p2592_p4, %p205_p6  ;;  %s145_s6 = sor.u32 %s144_s28, %s143_s30 }
   0xd   : > { %p146_p8 = scmp.eq.s32.totalorder %s145_s6, 0 }
   0xe   : > { %209 = sbr.rel (%p206_p7) target bundleno = 812 (0x32c), region = 40 }
   0xf   : > { %s3089_s8 = scalar_select %p146_p8, %s2973_s19, %s148_s7  }
  0x15   : > { %v361_v0 = vld [vmem:[%s4751_s2] sm:$0xff]  ;;  %v2995_v2 = vmov 0   ;;  %v362_v3 = vld [vmem:[%s4751_s2 + $0x8] sm:$0xff]  ;;  %v246_v5 = vld [vmem:[%s4750_s1 + $0x18] sm:$0xff]  ;;  %p234_p9 = scmp.lt.s32.totalorder %s2981_s21, 1  ;;  %p236_p10 = scmp.lt.s32.totalorder %s2977_s20, 1 }
  0x16   : > { %v243_v1 = vld [vmem:[%s4750_s1] sm:$0xff]  ;;  %2865 = vset.pattern.permute.xlu1 %v2995_v2  ;;  %2864 = vset.pattern.permute.xlu0 %v2995_v2  ;;  %v244_v4 = vld [vmem:[%s4750_s1 + $0x8] sm:$0xff]  ;;  %v245_v6 = vld [vmem:[%s4750_s1 + $0x10] sm:$0xff]  ;;  %s231_s16 = sand.u32 1, %s2969_s18   ;;  %s2669_s18 = sshll.u32 (%p3078_p5), %s2981_s21, 5 }
  0x17   : > { %379 = vperm.xlu1 %2865, %v361_v0   ;;  %261 = vperm.xlu0 %2864, %v243_v1   ;;  %v364_v7 = vld [vmem:[%s4751_s2 + $0x18] sm:$0xff]  ;;  %v363_v8 = vld [vmem:[%s4751_s2 + $0x10] sm:$0xff]  ;;  %v248_v9 = vld [vmem:[%s4750_s1 + $0x28] sm:$0xff]  ;;  %s235_s6 = scalar_select %p234_p9, %s2981_s21, 1 }
  0x18   : > { %v247_v10 = vld [vmem:[%s4750_s1 + $0x20] sm:$0xff]  ;;  %v366_v11 = vld [vmem:[%s4751_s2 + $0x28] sm:$0xff]  ;;  %v250_v13 = vld [vmem:[%s4750_s1 + $0x38] sm:$0xff]  ;;  %s237_s7 = scalar_select %p236_p10, %s2977_s20, 1 }
  0x19   : > { %v365_v12 = vld [vmem:[%s4751_s2 + $0x20] sm:$0xff]  ;;  %v249_v14 = vld [vmem:[%s4750_s1 + $0x30] sm:$0xff]  ;;  %v368_v15 = vld [vmem:[%s4751_s2 + $0x38] sm:$0xff]  ;;  %s2594_s9 = sshll.u32 %s235_s6, 1  ;;  %s2593_s17 = sshll.u32 %s231_s16, 7 }
  0x1a   : > { %v367_v16 = vld [vmem:[%s4751_s2 + $0x30] sm:$0xff]  ;;  %v252_v17 = vld [vmem:[%s4750_s1 + $0x48] sm:$0xff]  ;;  %v251_v18 = vld [vmem:[%s4750_s1 + $0x40] sm:$0xff]  ;;  %s239_s10 = sadd.s32 %s2594_s9, %s237_s7  ;;  %s4687_s27 = scalar_lea.vmem [#allocation2], %s2593_s17 }
  0x1b   : > { %384 = vperm.xlu1 %2865, %v362_v3   ;;  %266 = vperm.xlu0 %2864, %v244_v4   ;;  %v370_v19 = vld [vmem:[%s4751_s2 + $0x48] sm:$0xff]  ;;  %v369_v20 = vld [vmem:[%s4751_s2 + $0x40] sm:$0xff]  ;;  %v254_v21 = vld [vmem:[%s4750_s1 + $0x58] sm:$0xff]  ;;  %s3242_s13 = scalar_lea.vmem %s4749_s0, %s239_s10  ;;  %s2426_s29 = sadd.s32 (%p3078_p5), %s2977_s20, %s2669_s18 }
  0x1c   : > { %v253_v22 = vld [vmem:[%s4750_s1 + $0x50] sm:$0xff]  ;;  %v372_v23 = vld [vmem:[%s4751_s2 + $0x58] sm:$0xff]  ;;  %v256_v25 = vld [vmem:[%s4750_s1 + $0x68] sm:$0xff]  ;;  %s2670_s28 = sshll.u32 (%p3078_p5), %s2426_s29, 3 }
  0x1d   : > { %v371_v24 = vld [vmem:[%s4751_s2 + $0x50] sm:$0xff]  ;;  %v255_v26 = vld [vmem:[%s4750_s1 + $0x60] sm:$0xff]  ;;  %v374_v27 = vld [vmem:[%s4751_s2 + $0x68] sm:$0xff]  ;;  %s2428_s7 = scalar_lea.vmem (%p3078_p5), %s4754_s5, %s2670_s28 }
  0x1e   : > { %v373_v28 = vld [vmem:[%s4751_s2 + $0x60] sm:$0xff]  ;;  %v258_v29 = vld [vmem:[%s4750_s1 + $0x78] sm:$0xff]  ;;  %v257_v30 = vld [vmem:[%s4750_s1 + $0x70] sm:$0xff] }
  0x1f   : > { %276 = vperm.xlu1 %2865, %v246_v5   ;;  %271 = vperm.xlu0 %2864, %v245_v6   ;;  %v376_v31 = vld [vmem:[%s4751_s2 + $0x78] sm:$0xff]  ;;  %v375_v32 = vld [vmem:[%s4751_s2 + $0x70] sm:$0xff]  ;;  %v2162_v33 = vld [vmem:[%s4753_s4 + $0x8] sm:$0xff] }
  0x20   : > { %v2161_v34 = vld [vmem:[%s4753_s4] sm:$0xff]  ;;  %v2164_v35 = vld [vmem:[%s4753_s4 + $0x18] sm:$0xff]  ;;  %v2163_v36 = vld [vmem:[%s4753_s4 + $0x10] sm:$0xff] }
  0x21   : > { %v2166_v37 = vld [vmem:[%s4753_s4 + $0x28] sm:$0xff]  ;;  %v2165_v38 = vld [vmem:[%s4753_s4 + $0x20] sm:$0xff]  ;;  %v2168_v39 = vld [vmem:[%s4753_s4 + $0x38] sm:$0xff] }
  0x22   : > { %v2167_v40 = vld [vmem:[%s4753_s4 + $0x30] sm:$0xff]  ;;  %v2170_v41 = vld [vmem:[%s4753_s4 + $0x48] sm:$0xff]  ;;  %v2169_v42 = vld [vmem:[%s4753_s4 + $0x40] sm:$0xff] }
  0x23   : > { %394 = vperm.xlu1 %2865, %v364_v7   ;;  %389 = vperm.xlu0 %2864, %v363_v8   ;;  %v2172_v43 = vld [vmem:[%s4753_s4 + $0x58] sm:$0xff]  ;;  %v2171_v44 = vld [vmem:[%s4753_s4 + $0x50] sm:$0xff]  ;;  %v2174_v45 = vld [vmem:[%s4753_s4 + $0x68] sm:$0xff] }
  0x24   : > { %v2173_v46 = vld [vmem:[%s4753_s4 + $0x60] sm:$0xff]  ;;  %v2176_v47 = vld [vmem:[%s4753_s4 + $0x78] sm:$0xff]  ;;  %v2175_v48 = vld [vmem:[%s4753_s4 + $0x70] sm:$0xff] }
  0x25   : > { %v3245_v49 = vld [vmem:[%s3242_s13] ss:$0 sm:$0xff] }
  0x27   : > { %286 = vperm.xlu1 %2865, %v248_v9   ;;  %281 = vperm.xlu0 %2864, %v247_v10  }
  0x2b   : > { %404 = vperm.xlu1 %2865, %v366_v11   ;;  %399 = vperm.xlu0 %2864, %v365_v12  }
  0x2f   : > { %296 = vperm.xlu1 %2865, %v250_v13   ;;  %291 = vperm.xlu0 %2864, %v249_v14  }
  0x33   : > { %414 = vperm.xlu1 %2865, %v368_v15   ;;  %409 = vperm.xlu0 %2864, %v367_v16   ;;  %v4759_v16 = vmov 683565275  }
  0x37   : > { %306 = vperm.xlu1 %2865, %v252_v17   ;;  %301 = vperm.xlu0 %2864, %v251_v18   ;;  %v4757_v18 = vmov 2475754826  }
  0x3b   : > { %424 = vperm.xlu1 %2865, %v370_v19   ;;  %419 = vperm.xlu0 %2864, %v369_v20  }
  0x3f   : > { %316 = vperm.xlu1 %2865, %v254_v21   ;;  %311 = vperm.xlu0 %2864, %v253_v22   ;;  %v4769_v21 = vmov 2131351028  }
  0x43   : > { %434 = vperm.xlu1 %2865, %v372_v23   ;;  %429 = vperm.xlu0 %2864, %v371_v24   ;;  %v4761_v23 = vmov 2102212464  }
  0x47   : > { %326 = vperm.xlu1 %2865, %v256_v25   ;;  %321 = vperm.xlu0 %2864, %v255_v26   ;;  %v4776_v25 = vmov 920167782  }
  0x4b   : > { %444 = vperm.xlu1 %2865, %v374_v27   ;;  %439 = vperm.xlu0 %2864, %v373_v28  }
  0x4f   : > { %336 = vperm.xlu1 %2865, %v258_v29   ;;  %331 = vperm.xlu0 %2864, %v257_v30  }
  0x53   : > { %454 = vperm.xlu1 %2865, %v376_v31   ;;  %449 = vperm.xlu0 %2864, %v375_v32   ;;  %v4774_v32 = vmov 1326507024  }
  0x57   : > { %2184 = vperm.xlu1 %2865, %v2162_v33   ;;  %2179 = vperm.xlu0 %2864, %v2161_v34  }
  0x5b   : > { %2194 = vperm.xlu1 %2865, %v2164_v35   ;;  %2189 = vperm.xlu0 %2864, %v2163_v36  }
  0x5f   : > { %2204 = vperm.xlu1 %2865, %v2166_v37   ;;  %2199 = vperm.xlu0 %2864, %v2165_v38  }
  0x63   : > { %2214 = vperm.xlu1 %2865, %v2168_v39   ;;  %2209 = vperm.xlu0 %2864, %v2167_v40  }
  0x67   : > { %2224 = vperm.xlu1 %2865, %v2170_v41   ;;  %2219 = vperm.xlu0 %2864, %v2169_v42  }
  0x6b   : > { %2234 = vperm.xlu1 %2865, %v2172_v43   ;;  %2229 = vperm.xlu0 %2864, %v2171_v44  }
  0x6f   : > { %2244 = vperm.xlu1 %2865, %v2174_v45   ;;  %2239 = vperm.xlu0 %2864, %v2173_v46  }
  0x73   : > { %2254 = vperm.xlu1 %2865, %v2176_v47   ;;  %2249 = vperm.xlu0 %2864, %v2175_v48  }
  0x96   : > { %v380_v50 = vpop.permute.xlu1 %379  ;;  %v262_v51 = vpop.permute.xlu0 %261 }
  0x97   : > { %v345_v52 = vmul.f32 %v3245_v49, %v262_v51 }
  0x99   : > { %v3248_v53 = vadd.f32 %v380_v50, %v345_v52 }
  0x9a   : > { %v385_v54 = vpop.permute.xlu1 %384  ;;  %v267_v55 = vpop.permute.xlu0 %266 }
  0x9b   : > { %v473_v56 = vand.u32 2147483647, %v3248_v53  ;;  %v476_v57 = vand.u32 2139095040, %v3248_v53  ;;  %v346_v58 = vmul.f32 %v3245_v49, %v267_v55 }
  0x9d   : > { %v477_v59 = vshrl.u32 %v476_v57, 23  ;;  %v3253_v60 = vadd.f32 %v385_v54, %v346_v58  ;;  %v480_v61 = vand.u32 8388607, %v473_v56 }
  0x9e   : > { %v277_v62 = vpop.permute.xlu1 %276 }
  0x9f   : > { %v2596_v63 = vadd.s32 4294967169, %v477_v59  ;;  %v577_v0 = vand.u32 2147483647, %v3253_v60  ;;  %v580_v1 = vand.u32 2139095040, %v3253_v60  ;;  %v481_v3 = vor.u32 8388608, %v480_v61 }
  0xa0   : > { %v348_v9 = vmul.f32 %v3245_v49, %v277_v62 }
  0xa1   : > { %v483_v2 = vadd.s32 1, %v2596_v63  ;;  %v581_v4 = vshrl.u32 %v580_v1, 23  ;;  %v584_v5 = vand.u32 8388607, %v577_v0  ;;  %v3262_v12 = vshll.u32 %v481_v3, 8 }
  0xa2   : > { %v395_v6 = vpop.permute.xlu1 %394 }
  0xa3   : > { %vm484_vm0 = vcmp.gt.s32.totalorder %v483_v2, 0  ;;  %v2600_v8 = vadd.s32 4294967169, %v581_v4  ;;  %v585_v13 = vor.u32 8388608, %v584_v5  ;;  %v3264_v14 = vadd.f32 %v395_v6, %v348_v9 }
  0xa4   : > { %v485_v7 = vsel %vm484_vm0, %v483_v2, 0 }
  0xa5   : > { %v486_v10 = vshrl.u32 %v485_v7, 5  ;;  %v487_v11 = vand.u32 31, %v485_v7  ;;  %4796 = vst [vmem:[#allocation3_spill] sm:$0xff] %v3264_v14  ;;  %v587_v20 = vadd.s32 1, %v2600_v8  ;;  %v3286_v57 = vshll.u32 %v585_v13, 8 }
  0xa6   : > { %v788_v2 = vand.u32 2139095040, %v3264_v14 }
  0xa7   : > { %v488_v15 = vsub.s32 32, %v487_v11  ;;  %v490_v17 = vshll.u32 %v4759_v16, %v487_v11  ;;  %v493_v19 = vshll.u32 %v4757_v18, %v487_v11  ;;  %v496_v22 = vshll.u32 %v4769_v21, %v487_v11 }
  0xa8   : > { %v499_v24 = vshll.u32 %v4761_v23, %v487_v11  ;;  %v502_v26 = vshll.u32 %v4776_v25, %v487_v11  ;;  %vm505_vm1 = vcmp.lt.s32.totalorder %v486_v10, 1  ;;  %vm506_vm2 = vcmp.lt.s32.totalorder %v486_v10, 2 }
  0xa9   : > { %v491_v27 = vshrl.u32 %v4757_v18, %v488_v15  ;;  %v494_v28 = vshrl.u32 %v4769_v21, %v488_v15  ;;  %v497_v29 = vshrl.u32 %v4761_v23, %v488_v15  ;;  %v489_v30 = vshrl.u32 %v4759_v16, %v488_v15 }
  0xaa   : > { %v500_v31 = vshrl.u32 %v4776_v25, %v488_v15  ;;  %v503_v33 = vshrl.u32 %v4774_v32, %v488_v15  ;;  %vm507_vm3 = vcmp.lt.s32.totalorder %v486_v10, 3  ;;  %vm588_vm4 = vcmp.gt.s32.totalorder %v587_v20, 0 }
  0xab   : > { %v492_v34 = vor.u32 %v491_v27, %v490_v17  ;;  %v495_v35 = vor.u32 %v494_v28, %v493_v19  ;;  %v498_v36 = vor.u32 %v497_v29, %v496_v22  ;;  %vm508_vm5 = vcmp.lt.s32.totalorder %v486_v10, 4 }
  0xac   : > { %v501_v37 = vor.u32 %v500_v31, %v499_v24  ;;  %v504_v38 = vor.u32 %v503_v33, %v502_v26  ;;  %v589_v39 = vsel %vm588_vm4, %v587_v20, 0  ;;  %v272_v24 = vpop.permute.xlu0 %271  ;;  %v789_v26 = vshrl.u32 %v788_v2, 23 }
  0xad   : > { %v509_v40 = vsel %vm505_vm1, %v489_v30, %v492_v34  ;;  %v510_v41 = vsel %vm508_vm5, %v498_v36, 2102212464  ;;  %v513_v42 = vsel %vm505_vm1, %v492_v34, %v495_v35  ;;  %v517_v43 = vsel %vm505_vm1, %v495_v35, %v498_v36 }
  0xae   : > { %v511_v44 = vsel %vm507_vm3, %v495_v35, %v510_v41  ;;  %v514_v45 = vsel %vm508_vm5, %v501_v37, 920167782  ;;  %v518_v46 = vsel %vm508_vm5, %v504_v38, 1326507024  ;;  %v590_v47 = vshrl.u32 %v589_v39, 5 }
  0xaf   : > { %v512_v48 = vsel %vm506_vm2, %v509_v40, %v511_v44  ;;  %v515_v50 = vsel %vm507_vm3, %v498_v36, %v514_v45  ;;  %v519_v51 = vsel %vm507_vm3, %v501_v37, %v518_v46  ;;  %v591_v52 = vand.u32 31, %v589_v39 }
  0xb0   : > { %v516_v54 = vsel %vm506_vm2, %v513_v42, %v515_v50  ;;  %v520_v55 = vsel %vm506_vm2, %v517_v43, %v519_v51  ;;  %v528_v63 = vmul.u32 %v3262_v12, %v512_v48  ;;  %vm609_vm6 = vcmp.lt.s32.totalorder %v590_v47, 1 }
  0xb1   : > { %v3289_v58 = vmul.u32.u64.low %v3262_v12, %v520_v55  ;;  %v3290_v59 = vmul.u32.u64.high %v3262_v12, %v520_v55, %v3289_v58  ;;  %v3293_v61 = vmul.u32.u64.low %v3262_v12, %v516_v54  ;;  %v3294_v62 = vmul.u32.u64.high %v3262_v12, %v516_v54, %v3293_v61 }
  0xb2   : > { %v592_v1 = vsub.s32 32, %v591_v52  ;;  %v594_v3 = vshll.u32 %v4759_v16, %v591_v52  ;;  %v597_v4 = vshll.u32 %v4757_v18, %v591_v52  ;;  %v600_v5 = vshll.u32 %v4769_v21, %v591_v52 }
  0xb3   : > { %v603_v6 = vshll.u32 %v4761_v23, %v591_v52  ;;  %v606_v10 = vshll.u32 %v4776_v25, %v591_v52  ;;  %vm530_vm7 = vc.u32 %v3290_v59, %v3293_v61  ;;  %v531_v11 = vadd.s32 1, %v3294_v62  ;;  %v390_v52 = vpop.permute.xlu0 %389 }
  0xb4   : > { %v595_v7 = vshrl.u32 %v4757_v18, %v592_v1  ;;  %v598_v8 = vshrl.u32 %v4769_v21, %v592_v1  ;;  %v601_v9 = vshrl.u32 %v4761_v23, %v592_v1  ;;  %v604_v12 = vshrl.u32 %v4776_v25, %v592_v1 }
  0xb5   : > { %vm610_vm8 = vcmp.lt.s32.totalorder %v590_v47, 2  ;;  %v607_v19 = vshrl.u32 %v4774_v32, %v592_v1  ;;  %v532_v20 = vsel %vm530_vm7, %v531_v11, %v3294_v62  ;;  %vm612_vm9 = vcmp.lt.s32.totalorder %v590_v47, 4 }
  0xb6   : > { %v596_v13 = vor.u32 %v595_v7, %v594_v3  ;;  %v599_v15 = vor.u32 %v598_v8, %v597_v4  ;;  %v602_v17 = vor.u32 %v601_v9, %v600_v5  ;;  %v605_v22 = vor.u32 %v604_v12, %v603_v6 }
  0xb7   : > { %v533_v27 = vadd.s32 %v532_v20, %v528_v63  ;;  %v593_v28 = vshrl.u32 %v4759_v16, %v592_v1  ;;  %v608_v29 = vor.u32 %v607_v19, %v606_v10  ;;  %vm611_vm10 = vcmp.lt.s32.totalorder %v590_v47, 3 }
  0xb8   : > { %v614_v30 = vsel %vm612_vm9, %v602_v17, 2102212464  ;;  %v617_v31 = vsel %vm609_vm6, %v596_v13, %v599_v15  ;;  %v618_v33 = vsel %vm612_vm9, %v605_v22, 920167782  ;;  %v621_v34 = vsel %vm609_vm6, %v599_v15, %v602_v17 }
  0xb9   : > { %v534_v35 = vadd.s32 536870912, %v533_v27  ;;  %v613_v36 = vsel %vm609_vm6, %v593_v28, %v596_v13  ;;  %v619_v37 = vsel %vm611_vm10, %v602_v17, %v618_v33  ;;  %v622_v38 = vsel %vm612_vm9, %v608_v29, 1326507024 }
  0xba   : > { %v615_v39 = vsel %vm611_vm10, %v599_v15, %v614_v30  ;;  %v620_v40 = vsel %vm610_vm8, %v617_v31, %v619_v37  ;;  %v623_v41 = vsel %vm611_vm10, %v605_v22, %v622_v38  ;;  %v2608_v42 = vadd.s32 4294967169, %v789_v26 }
  0xbb   : > { %v3318_v43 = vshrl.u32 %v534_v35, 30  ;;  %v624_v44 = vsel %vm610_vm8, %v621_v34, %v623_v41  ;;  %v3322_v45 = vmul.u32.u64.low %v3286_v57, %v620_v40  ;;  %v3323_v46 = vmul.u32.u64.high %v3286_v57, %v620_v40, %v3322_v45 }
  0xbc   : > { %v3327_v48 = vmul.u32.u64.low %v3286_v57, %v624_v44  ;;  %v3328_v50 = vmul.u32.u64.high %v3286_v57, %v624_v44, %v3327_v48  ;;  %v795_v51 = vadd.s32 1, %v2608_v42  ;;  %v616_v55 = vsel %vm610_vm8, %v613_v36, %v615_v39 }
  0xbd   : > { %v536_v54 = vshll.u32 %v3318_v43, 30  ;;  %v347_v58 = vmul.f32 %v3245_v49, %v272_v24  ;;  %v785_v62 = vand.u32 2147483647, %v3264_v14  ;;  %v635_v1 = vadd.s32 1, %v3323_v46 }
  0xbe   : > { %vm796_vm11 = vcmp.gt.s32.totalorder %v795_v51, 0  ;;  %v632_v4 = vmul.u32 %v3286_v57, %v616_v55  ;;  %vm634_vm12 = vc.u32 %v3328_v50, %v3322_v45  ;;  %vm475_vm5 = vcmp.lt.s32.totalorder %v3248_v53, 0 }
  0xbf   : > { %v3334_v63 = vsub.s32 %v533_v27, %v536_v54  ;;  %v797_v2 = vsel %vm796_vm11, %v795_v51, 0  ;;  %v3337_v3 = vadd.f32 %v390_v52, %v347_v58  ;;  %v636_v6 = vsel %vm634_vm12, %v635_v1, %v3323_v46 }
  0xc0   : > { %v799_v5 = vand.u32 31, %v797_v2  ;;  %v637_v7 = vadd.s32 %v636_v6, %v632_v4  ;;  %v792_v8 = vand.u32 8388607, %v785_v62  ;;  %v798_v28 = vshrl.u32 %v797_v2, 5 }
  0xc1   : > { %v539_v47 = vsub.s32 0, %v3334_v63  ;;  %v684_v57 = vand.u32 2139095040, %v3337_v3  ;;  %v681_v38 = vand.u32 2147483647, %v3337_v3  ;;  %vm3433_vm10 = vcmp.le.f32.partialorder %v473_v56, 0.7853982 }
  0xc2   : > { %v800_v9 = vsub.s32 32, %v799_v5  ;;  %v802_v11 = vshll.u32 %v4759_v16, %v799_v5  ;;  %v805_v12 = vshll.u32 %v4757_v18, %v799_v5  ;;  %v638_v13 = vadd.s32 536870912, %v637_v7 }
  0xc3   : > { %v2597_v10 = vmin.u32 %v539_v47, %v3334_v63  ;;  %v808_v19 = vshll.u32 %v4769_v21, %v799_v5  ;;  %v811_v29 = vshll.u32 %v4761_v23, %v799_v5  ;;  %v814_v30 = vshll.u32 %v4776_v25, %v799_v5 }
  0xc4   : > { %v803_v15 = vshrl.u32 %v4757_v18, %v800_v9  ;;  %v806_v17 = vshrl.u32 %v4769_v21, %v800_v9  ;;  %v809_v22 = vshrl.u32 %v4761_v23, %v800_v9  ;;  %v812_v24 = vshrl.u32 %v4776_v25, %v800_v9 }
  0xc5   : > { %v541_v20 = vclz %v2597_v10  ;;  %v815_v26 = vshrl.u32 %v4774_v32, %v800_v9  ;;  %v3356_v27 = vshrl.u32 %v638_v13, 30  ;;  %v793_v39 = vor.u32 8388608, %v792_v8 }
  0xc6   : > { %v804_v33 = vor.u32 %v803_v15, %v802_v11  ;;  %v807_v34 = vor.u32 %v806_v17, %v805_v12  ;;  %v810_v35 = vor.u32 %v809_v22, %v808_v19  ;;  %v813_v37 = vor.u32 %v812_v24, %v811_v29 }
  0xc7   : > { %v2598_v31 = vadd.s32 4294967294, %v541_v20  ;;  %v640_v36 = vshll.u32 %v3356_v27, 30  ;;  %v816_v40 = vor.u32 %v815_v26, %v814_v30  ;;  %v685_v41 = vshrl.u32 %v684_v57, 23 }
  0xc8   : > { %vm817_vm14 = vcmp.lt.s32.totalorder %v798_v28, 1  ;;  %vm820_vm15 = vcmp.lt.s32.totalorder %v798_v28, 4  ;;  %v801_v46 = vshrl.u32 %v4759_v16, %v800_v9  ;;  %vm819_vm0 = vcmp.lt.s32.totalorder %v798_v28, 3 }
  0xc9   : > { %vm2599_vm13 = vcmp.lt.s32.totalorder %v2598_v31, 0  ;;  %v3362_v44 = vsub.s32 %v637_v7, %v640_v36  ;;  %v822_v48 = vsel %vm820_vm15, %v810_v35, 2102212464  ;;  %v825_v51 = vsel %vm817_vm14, %v804_v33, %v807_v34 }
  0xca   : > { %v544_v42 = vsel %vm2599_vm13, 0, %v2598_v31  ;;  %v826_v55 = vsel %vm820_vm15, %v813_v37, 920167782  ;;  %v829_v58 = vsel %vm817_vm14, %v807_v34, %v810_v35  ;;  %vm818_vm1 = vcmp.lt.s32.totalorder %v798_v28, 2 }
  0xcb   : > { %v549_v52 = vsub.s32 4294967266, %v544_v42  ;;  %v643_v54 = vsub.s32 0, %v3362_v44  ;;  %v827_v1 = vsel %vm819_vm0, %v810_v35, %v826_v55  ;;  %v830_v2 = vsel %vm820_vm15, %v816_v40, 1326507024 }
  0xcc   : > { %v833_v4 = vshll.u32 %v793_v39, 8  ;;  %v821_v47 = vsel %vm817_vm14, %v801_v46, %v804_v33  ;;  %v828_v6 = vsel %vm818_vm1, %v825_v51, %v827_v1  ;;  %v831_v7 = vsel %vm819_vm0, %v813_v37, %v830_v2 }
  0xcd   : > { %v2601_v5 = vmin.u32 %v643_v54, %v3362_v44  ;;  %v545_v8 = vsub.s32 32, %v544_v42  ;;  %v823_v9 = vsel %vm819_vm0, %v807_v34, %v822_v48  ;;  %v832_v10 = vsel %vm818_vm1, %v829_v58, %v831_v7  ;;  %v287_v7 = vpop.permute.xlu1 %286 }
  0xce   : > { %v2604_v11 = vadd.s32 4294967169, %v685_v41  ;;  %v550_v12 = vadd.s32 127, %v549_v52  ;;  %v3372_v13 = vmul.u32.u64.low %v833_v4, %v832_v10  ;;  %v3373_v15 = vmul.u32.u64.high %v833_v4, %v832_v10, %v3372_v13 }
  0xcf   : > { %v645_v57 = vclz %v2601_v5  ;;  %v529_v17 = vadd.s32 %v3293_v61, %v3290_v59  ;;  %v3377_v19 = vmul.u32.u64.low %v833_v4, %v828_v6  ;;  %v3378_v20 = vmul.u32.u64.high %v833_v4, %v828_v6, %v3377_v19 }
  0xd0   : > { %v691_v24 = vadd.s32 1, %v2604_v11  ;;  %v824_v29 = vsel %vm818_vm1, %v821_v47, %v823_v9  ;;  %v688_v30 = vand.u32 8388607, %v681_v38  ;;  %v551_v31 = vshll.u32 %v550_v12, 23 }
  0xd1   : > { %v2602_v22 = vadd.s32 4294967294, %v645_v57  ;;  %v547_v26 = vshrl.u32 %v529_v17, %v545_v8  ;;  %vm842_vm3 = vc.u32 %v3373_v15, %v3377_v19  ;;  %v546_v59 = vshll.u32 %v3334_v63, %v544_v42 }
  0xd2   : > { %vm692_vm4 = vcmp.gt.s32.totalorder %v691_v24, 0  ;;  %v843_v33 = vadd.s32 1, %v3378_v20  ;;  %v840_v36 = vmul.u32 %v833_v4, %v824_v29  ;;  %v689_v39 = vor.u32 8388608, %v688_v30 }
  0xd3   : > { %vm2603_vm2 = vcmp.lt.s32.totalorder %v2602_v22, 0  ;;  %v693_v34 = vsel %vm692_vm4, %v691_v24, 0  ;;  %v548_v37 = vor.u32 %v547_v26, %v546_v59  ;;  %v552_v41 = vor.u32 4788187, %v551_v31 }
  0xd4   : > { %v648_v61 = vsel %vm2603_vm2, 0, %v2602_v22  ;;  %v844_v28 = vsel %vm842_vm3, %v843_v33, %v3378_v20  ;;  %v695_v40 = vand.u32 31, %v693_v34  ;;  %v633_v54 = vadd.s32 %v3322_v45, %v3328_v50 }
  0xd5   : > { %v653_v35 = vsub.s32 4294967266, %v648_v61  ;;  %v845_v48 = vadd.s32 %v844_v28, %v840_v36  ;;  %v649_v51 = vsub.s32 32, %v648_v61  ;;  %v555_v55 = vcvt.s32.f32 %v548_v37 }
  0xd6   : > { %v696_v52 = vsub.s32 32, %v695_v40  ;;  %v3393_v2 = vshll.u32 %v689_v39, 8  ;;  %v553_v4 = vand.u32 2147483647, %v552_v41  ;;  %v650_v5 = vshll.u32 %v3362_v44, %v648_v61 }
  0xd7   : > { %v654_v46 = vadd.s32 127, %v653_v35  ;;  %v846_v42 = vadd.s32 536870912, %v845_v48  ;;  %v698_v6 = vshll.u32 %v4759_v16, %v695_v40  ;;  %v651_v8 = vshrl.u32 %v633_v54, %v649_v51  ;;  %v405_v35 = vpop.permute.xlu1 %404 }
  0xd8   : > { %v699_v58 = vshrl.u32 %v4757_v18, %v696_v52  ;;  %v702_v1 = vshrl.u32 %v4769_v21, %v696_v52  ;;  %v694_v9 = vshrl.u32 %v693_v34, 5  ;;  %v701_v45 = vshll.u32 %v4757_v18, %v695_v40 }
  0xd9   : > { %v655_v63 = vshll.u32 %v654_v46, 23  ;;  %v3396_v47 = vshrl.u32 %v846_v42, 30  ;;  %v705_v50 = vshrl.u32 %v4761_v23, %v696_v52  ;;  %v704_v57 = vshll.u32 %v4769_v21, %v695_v40 }
  0xda   : > { %v700_v12 = vor.u32 %v699_v58, %v698_v6  ;;  %v703_v13 = vor.u32 %v702_v1, %v701_v45  ;;  %v707_v44 = vshll.u32 %v4761_v23, %v695_v40  ;;  %v708_v17 = vshrl.u32 %v4776_v25, %v696_v52 }
  0xdb   : > { %v656_v10 = vor.u32 4788187, %v655_v63  ;;  %v848_v11 = vshll.u32 %v3396_v47, 30  ;;  %v711_v20 = vshrl.u32 %v4774_v32, %v696_v52  ;;  %v706_v24 = vor.u32 %v705_v50, %v704_v57 }
  0xdc   : > { %v710_v26 = vshll.u32 %v4776_v25, %v695_v40  ;;  %v350_v29 = vmul.f32 %v3245_v49, %v287_v7  ;;  %v556_v30 = vmul.f32 %v555_v55, %v553_v4  ;;  %v652_v31 = vor.u32 %v651_v8, %v650_v5 }
  0xdd   : > { %v3407_v22 = vsub.s32 %v845_v48, %v848_v11  ;;  %v709_v59 = vor.u32 %v708_v17, %v707_v44  ;;  %vm713_vm6 = vcmp.lt.s32.totalorder %v694_v9, 1  ;;  %v697_v33 = vshrl.u32 %v4759_v16, %v696_v52  ;;  %v282_v52 = vpop.permute.xlu0 %281 }
  0xde   : > { %v712_v34 = vor.u32 %v711_v20, %v710_v26  ;;  %vm716_vm7 = vcmp.lt.s32.totalorder %v694_v9, 4  ;;  %v657_v36 = vand.u32 2147483647, %v656_v10  ;;  %vm715_vm8 = vcmp.lt.s32.totalorder %v694_v9, 3 }
  0xdf   : > { %v851_v61 = vsub.s32 0, %v3407_v22  ;;  %v721_v37 = vsel %vm713_vm6, %v700_v12, %v703_v13  ;;  %v722_v28 = vsel %vm716_vm7, %v709_v59, 920167782  ;;  %vm714_vm9 = vcmp.lt.s32.totalorder %v694_v9, 2 }
  0xe0   : > { %v718_v40 = vsel %vm716_vm7, %v706_v24, 2102212464  ;;  %v723_v41 = vsel %vm715_vm8, %v706_v24, %v722_v28  ;;  %v557_v46 = vxor.u32 2147483648, %v556_v30  ;;  %v725_v51 = vsel %vm713_vm6, %v703_v13, %v706_v24 }
  0xe1   : > { %v2609_v39 = vmin.u32 %v851_v61, %v3407_v22  ;;  %v724_v48 = vsel %vm714_vm9, %v721_v37, %v723_v41  ;;  %v3420_v54 = vadd.f32 %v405_v35, %v350_v29  ;;  %v659_v63 = vcvt.s32.f32 %v652_v31  ;;  %v400_v29 = vpop.permute.xlu0 %399 }
  0xe2   : > { %v717_v55 = vsel %vm713_vm6, %v697_v33, %v700_v12  ;;  %v726_v58 = vsel %vm716_vm7, %v712_v34, 1326507024  ;;  %v719_v1 = vsel %vm715_vm8, %v703_v13, %v718_v40  ;;  %v558_v10 = vsel %vm475_vm5, %v557_v46, %v556_v30  ;;  %v297_v30 = vpop.permute.xlu1 %296 }
  0xe3   : > { %4797 = vst [vmem:[#allocation4_spill] sm:$0xff] %v3420_v54  ;;  %v853_v42 = vclz %v2609_v39  ;;  %v727_v4 = vsel %vm715_vm8, %v709_v59, %v726_v58  ;;  %v3427_v5 = vmul.u32.u64.low %v3393_v2, %v724_v48  ;;  %v3428_v6 = vmul.u32.u64.high %v3393_v2, %v724_v48, %v3427_v5 }
  0xe4   : > { %v660_v8 = vmul.f32 %v659_v63, %v657_v36  ;;  %v728_v50 = vsel %vm714_vm9, %v725_v51, %v727_v4  ;;  %v996_v57 = vand.u32 2139095040, %v3420_v54  ;;  %v559_v13 = vsub.s32 4, %v3318_v43 }
  0xe5   : > { %v2610_v45 = vadd.s32 4294967294, %v853_v42  ;;  %v3441_v11 = vmul.u32.u64.low %v3393_v2, %v728_v50  ;;  %v3442_v12 = vmul.u32.u64.high %v3393_v2, %v728_v50, %v3441_v11  ;;  %vm579_vm11 = vcmp.lt.s32.totalorder %v3253_v60, 0 }
  0xe6   : > { %v720_v56 = vsel %vm714_vm9, %v717_v55, %v719_v1  ;;  %vm3450_vm13 = vcmp.le.f32.partialorder %v577_v0, 0.7853982  ;;  %v663_v17 = vsub.s32 4, %v3356_v27  ;;  %v739_v24 = vadd.s32 1, %v3428_v6 }
  0xe7   : > { %vm2611_vm12 = vcmp.lt.s32.totalorder %v2610_v45, 0  ;;  %v997_v26 = vshrl.u32 %v996_v57, 23  ;;  %v561_v9 = vsel %vm3433_vm10, %v3248_v53, %v558_v10  ;;  %v661_v31 = vxor.u32 2147483648, %v660_v8 }
  0xe8   : > { %v3455_v20 = vsel %vm2611_vm12, 0, %v2610_v45  ;;  %v871_v59 = vsub.s32 4, %v3396_v47  ;;  %v349_v0 = vmul.f32 %v3245_v49, %v282_v52  ;;  %v736_v61 = vmul.u32 %v3393_v2, %v720_v56  ;;  %v415_v52 = vpop.permute.xlu1 %414 }
  0xe9   : > { %vm738_vm14 = vc.u32 %v3442_v12, %v3427_v5  ;;  %v993_v33 = vand.u32 2147483647, %v3420_v54  ;;  %v2616_v34 = vadd.s32 4294967169, %v997_v26  ;;  %vm787_vm15 = vcmp.lt.s32.totalorder %v3264_v14, 0 }
  0xea   : > { %v861_v35 = vsub.s32 4294967266, %v3455_v20  ;;  %v740_v36 = vsel %vm738_vm14, %v739_v24, %v3428_v6  ;;  %v3470_v37 = vadd.f32 %v400_v29, %v349_v0  ;;  %v3475_v28 = vsel %vm475_vm5, %v559_v13, %v3318_v43 }
  0xeb   : > { %vm3479_vm0 = vcmp.le.f32.partialorder %v785_v62, 0.7853982  ;;  %v741_v39 = vadd.s32 %v740_v36, %v736_v61  ;;  %v1003_v40 = vadd.s32 1, %v2616_v34  ;;  %2874 = vcosq.f32 %v561_v9 }
  0xec   : > { %4802 = vst [vmem:[#allocation5_spill] sm:$0xff] %v3470_v37  ;;  %v3486_v41 = vsel %vm579_vm11, %v663_v17, %v3356_v27  ;;  %v3491_v46 = vsel %vm787_vm15, %v871_v59, %v3396_v47  ;;  %v352_v43 = vmul.f32 %v3245_v49, %v297_v30  ;;  %v662_v62 = vsel %vm579_vm11, %v661_v31, %v660_v8 }
  0xed   : > { %v742_v48 = vadd.s32 536870912, %v741_v39  ;;  %v1000_v51 = vand.u32 8388607, %v993_v33  ;;  %vm1004_vm1 = vcmp.gt.s32.totalorder %v1003_v40, 0  ;;  %v857_v63 = vsub.s32 32, %v3455_v20 }
  0xee   : > { %v862_v27 = vadd.s32 127, %v861_v35  ;;  %v1005_v42 = vsel %vm1004_vm1, %v1003_v40, 0  ;;  %v892_v55 = vand.u32 2139095040, %v3470_v37  ;;  %2876 = vsinq.f32 %v561_v9 }
  0xef   : > { %v841_v47 = vadd.s32 %v3377_v19, %v3373_v15  ;;  %v3502_v58 = vshrl.u32 %v742_v48, 30  ;;  %v1007_v1 = vand.u32 31, %v1005_v42  ;;  %v3507_v4 = vsel %vm3450_vm13, %v3253_v60, %v662_v62 }
  0xf0   : > { %v874_v6 = vsel %vm3479_vm0, 0, %v3491_v46  ;;  %v889_v8 = vand.u32 2147483647, %v3470_v37  ;;  %v3513_v45 = vadd.f32 %v415_v52, %v352_v43  ;;  %v858_v50 = vshll.u32 %v3407_v22, %v3455_v20 }
  0xf1   : > { %v744_v15 = vshll.u32 %v3502_v58, 30  ;;  %v1001_v19 = vor.u32 8388608, %v1000_v51  ;;  %v1008_v10 = vsub.s32 32, %v1007_v1  ;;  %v859_v11 = vshrl.u32 %v841_v47, %v857_v63 }
  0xf2   : > { %4805 = vst [vmem:[#allocation6_spill] sm:$0xff] %v3513_v45  ;;  %v863_v57 = vshll.u32 %v862_v27, 23  ;;  %v737_v13 = vadd.s32 %v3427_v5, %v3442_v12  ;;  %v893_v56 = vshrl.u32 %v892_v55, 23  ;;  %v1006_v24 = vshrl.u32 %v1005_v42, 5 }
  0xf3   : > { %v3520_v17 = vsub.s32 %v741_v39, %v744_v15  ;;  %v1010_v26 = vshll.u32 %v4759_v16, %v1007_v1  ;;  %v1011_v29 = vshrl.u32 %v4757_v18, %v1008_v10  ;;  %v1013_v30 = vshll.u32 %v4757_v18, %v1007_v1 }
  0xf4   : > { %v1014_v22 = vshrl.u32 %v4769_v21, %v1008_v10  ;;  %v1016_v20 = vshll.u32 %v4769_v21, %v1007_v1  ;;  %v1017_v9 = vshrl.u32 %v4761_v23, %v1008_v10  ;;  %v1019_v5 = vshll.u32 %v4761_v23, %v1007_v1 }
  0xf5   : > { %v747_v31 = vsub.s32 0, %v3520_v17  ;;  %v1020_v12 = vshrl.u32 %v4776_v25, %v1008_v10  ;;  %v3531_v59 = vshll.u32 %v1001_v19, 8  ;;  %v3533_v0 = vpop.eup %2874  ;;  %v860_v61 = vor.u32 %v859_v11, %v858_v50 }
  0xf6   : > { %v1012_v34 = vor.u32 %v1011_v29, %v1010_v26  ;;  %v1015_v35 = vor.u32 %v1014_v22, %v1013_v30  ;;  %v1018_v36 = vor.u32 %v1017_v9, %v1016_v20  ;;  %v1022_v43 = vshll.u32 %v4776_v25, %v1007_v1 }
  0xf7   : > { %v2605_v39 = vmin.u32 %v747_v31, %v3520_v17  ;;  %v1021_v40 = vor.u32 %v1020_v12, %v1019_v5  ;;  %v1023_v62 = vshrl.u32 %v4774_v32, %v1008_v10  ;;  %v864_v48 = vor.u32 4788187, %v863_v57 }
  0xf8   : > { %v1009_v51 = vshrl.u32 %v4759_v16, %v1008_v10  ;;  %vm1025_vm2 = vcmp.lt.s32.totalorder %v1006_v24, 1  ;;  %v2612_v52 = vadd.s32 4294967169, %v893_v56  ;;  %v3539_v63 = vpop.eup %2876  ;;  %vm1026_vm3 = vcmp.lt.s32.totalorder %v1006_v24, 2 }
  0xf9   : > { %v749_v27 = vclz %v2605_v39  ;;  %v1024_v42 = vor.u32 %v1023_v62, %v1022_v43  ;;  %vm1028_vm4 = vcmp.lt.s32.totalorder %v1006_v24, 4  ;;  %vm1027_vm5 = vcmp.lt.s32.totalorder %v1006_v24, 3 }
  0xfa   : > { %v1030_v55 = vsel %vm1028_vm4, %v1018_v36, 2102212464  ;;  %v1033_v47 = vsel %vm1025_vm2, %v1012_v34, %v1015_v35  ;;  %v1034_v50 = vsel %vm1028_vm4, %v1021_v40, 920167782  ;;  %v1029_v19 = vsel %vm1025_vm2, %v1009_v51, %v1012_v34 }
  0xfb   : > { %v2606_v15 = vadd.s32 4294967294, %v749_v27  ;;  %v1035_v1 = vsel %vm1027_vm5, %v1018_v36, %v1034_v50  ;;  %v1037_v11 = vsel %vm1025_vm2, %v1015_v35, %v1018_v36  ;;  %v1031_v26 = vsel %vm1027_vm5, %v1015_v35, %v1030_v55 }
  0xfc   : > { %v1036_v57 = vsel %vm1026_vm3, %v1033_v47, %v1035_v1  ;;  %v1038_v10 = vsel %vm1028_vm4, %v1024_v42, 1326507024  ;;  %v899_v29 = vadd.s32 1, %v2612_v52  ;;  %v865_v20 = vand.u32 2147483647, %v864_v48 }
  0xfd   : > { %vm2607_vm6 = vcmp.lt.s32.totalorder %v2606_v15, 0  ;;  %v1039_v56 = vsel %vm1027_vm5, %v1021_v40, %v1038_v10  ;;  %v3543_v30 = vmul.u32.u64.low %v3531_v59, %v1036_v57  ;;  %v3544_v22 = vmul.u32.u64.high %v3531_v59, %v1036_v57, %v3543_v30 }
  0xfe   : > { %v752_v9 = vsel %vm2607_vm6, 0, %v2606_v15  ;;  %v1040_v31 = vsel %vm1026_vm3, %v1037_v11, %v1039_v56  ;;  %vm900_vm7 = vcmp.gt.s32.totalorder %v899_v29, 0  ;;  %v1032_v34 = vsel %vm1026_vm3, %v1029_v19, %v1031_v26 }
  0xff   : > { %v753_v5 = vsub.s32 32, %v752_v9  ;;  %v757_v12 = vsub.s32 4294967266, %v752_v9  ;;  %v901_v35 = vsel %vm900_vm7, %v899_v29, 0  ;;  %v867_v36 = vcvt.s32.f32 %v860_v61 }
 0x100   : > { %v3550_v39 = vmul.u32.u64.low %v3531_v59, %v1040_v31  ;;  %v3551_v43 = vmul.u32.u64.high %v3531_v59, %v1040_v31, %v3550_v39  ;;  %v903_v40 = vand.u32 31, %v901_v35  ;;  %v1051_v52 = vadd.s32 1, %v3544_v22 }
 0x101   : > { %v755_v62 = vshrl.u32 %v737_v13, %v753_v5  ;;  %v758_v51 = vadd.s32 127, %v757_v12  ;;  %v896_v48 = vand.u32 8388607, %v889_v8  ;;  %v868_v27 = vmul.f32 %v867_v36, %v865_v20 }
 0x102   : > { %v1048_v42 = vmul.u32 %v3531_v59, %v1032_v34  ;;  %v904_v55 = vsub.s32 32, %v903_v40  ;;  %v1204_v24 = vand.u32 2139095040, %v3513_v45  ;;  %v754_v61 = vshll.u32 %v3520_v17, %v752_v9 }
 0x103   : > { %v759_v47 = vshll.u32 %v758_v51, 23  ;;  %v3559_v50 = vshrl.u32 %v901_v35, 5  ;;  %v906_v15 = vshll.u32 %v4759_v16, %v903_v40  ;;  %vm1050_vm8 = vc.u32 %v3551_v43, %v3543_v30 }
 0x104   : > { %v907_v13 = vshrl.u32 %v4757_v18, %v904_v55  ;;  %v909_v19 = vshll.u32 %v4757_v18, %v903_v40  ;;  %v912_v1 = vshll.u32 %v4769_v21, %v903_v40  ;;  %v756_v59 = vor.u32 %v755_v62, %v754_v61 }
 0x105   : > { %v760_v11 = vor.u32 4788187, %v759_v47  ;;  %v1052_v26 = vsel %vm1050_vm8, %v1051_v52, %v3544_v22  ;;  %v910_v17 = vshrl.u32 %v4769_v21, %v904_v55  ;;  %vm683_vm9 = vcmp.lt.s32.totalorder %v3337_v3, 0 }
 0x106   : > { %v1053_v57 = vadd.s32 %v1052_v26, %v1048_v42  ;;  %v913_v10 = vshrl.u32 %v4761_v23, %v904_v55  ;;  %v915_v29 = vshll.u32 %v4761_v23, %v903_v40  ;;  %v916_v56 = vshrl.u32 %v4776_v25, %v904_v55 }
 0x107   : > { %v908_v20 = vor.u32 %v907_v13, %v906_v15  ;;  %v911_v9 = vor.u32 %v910_v17, %v909_v19  ;;  %v918_v31 = vshll.u32 %v4776_v25, %v903_v40  ;;  %v919_v5 = vshrl.u32 %v4774_v32, %v904_v55 }
 0x108   : > { %v761_v12 = vand.u32 2147483647, %v760_v11  ;;  %v1054_v34 = vadd.s32 536870912, %v1053_v57  ;;  %v914_v22 = vor.u32 %v913_v10, %v912_v1  ;;  %v917_v35 = vor.u32 %v916_v56, %v915_v29 }
 0x109   : > { %v869_v36 = vxor.u32 2147483648, %v868_v27  ;;  %v767_v39 = vsub.s32 4, %v3502_v58  ;;  %v897_v62 = vor.u32 8388608, %v896_v48  ;;  %v920_v51 = vor.u32 %v919_v5, %v918_v31 }
 0x10a   : > { %v763_v52 = vcvt.s32.f32 %v756_v59  ;;  %v3576_v42 = vshrl.u32 %v1054_v34, 30  ;;  %vm921_vm11 = vcmp.lt.s32.totalorder %v3559_v50, 1  ;;  %vm924_vm12 = vcmp.lt.s32.totalorder %v3559_v50, 4 }
 0x10b   : > { %vm3582_vm14 = vcmp.le.f32.partialorder %v681_v38, 0.7853982  ;;  %vm923_vm1 = vcmp.lt.s32.totalorder %v3559_v50, 3  ;;  %v929_v61 = vsel %vm921_vm11, %v908_v20, %v911_v9  ;;  %v930_v48 = vsel %vm924_vm12, %v917_v35, 920167782 }
 0x10c   : > { %v1205_v47 = vshrl.u32 %v1204_v24, 23  ;;  %v764_v15 = vmul.f32 %v763_v52, %v761_v12  ;;  %v1056_v13 = vshll.u32 %v3576_v42, 30  ;;  %v931_v19 = vsel %vm923_vm1, %v914_v22, %v930_v48 }
 0x10d   : > { %v933_v1 = vsel %vm921_vm11, %v911_v9, %v914_v22  ;;  %vm922_vm2 = vcmp.lt.s32.totalorder %v3559_v50, 2  ;;  %v926_v38 = vsel %vm924_vm12, %v914_v22, 2102212464  ;;  %v934_v59 = vsel %vm924_vm12, %v920_v51, 1326507024  ;;  %v292_v22 = vpop.permute.xlu0 %291 }
 0x10e   : > { %v937_v11 = vshll.u32 %v897_v62, 8  ;;  %v3595_v26 = vsub.s32 %v1053_v57, %v1056_v13  ;;  %v905_v17 = vshrl.u32 %v4759_v16, %v904_v55  ;;  %v932_v24 = vsel %vm922_vm2, %v929_v61, %v931_v19 }
 0x10f   : > { %v935_v10 = vsel %vm923_vm1, %v917_v35, %v934_v59  ;;  %v870_v29 = vsel %vm787_vm15, %v869_v36, %v868_v27  ;;  %v768_v56 = vsel %vm683_vm9, %v767_v39, %v3502_v58  ;;  %v2624_v57 = vadd.s32 4294967169, %v1205_v47 }
 0x110   : > { %v936_v31 = vsel %vm922_vm2, %v933_v1, %v935_v10  ;;  %v765_v5 = vxor.u32 2147483648, %v764_v15  ;;  %v1059_v55 = vsub.s32 0, %v3595_v26  ;;  %v925_v12 = vsel %vm921_vm11, %v905_v17, %v908_v20 }
 0x111   : > { %v927_v34 = vsel %vm923_vm1, %v911_v9, %v926_v38  ;;  %v3614_v35 = vmul.u32.u64.low %v937_v11, %v936_v31  ;;  %v3615_v27 = vmul.u32.u64.high %v937_v11, %v936_v31, %v3614_v35  ;;  %2878 = vcosq.f32 %v3507_v4  ;;  %v410_v59 = vpop.permute.xlu0 %409 }
 0x112   : > { %v3617_v36 = vmul.u32.u64.low %v937_v11, %v932_v24  ;;  %v3618_v62 = vmul.u32.u64.high %v937_v11, %v932_v24, %v3617_v36  ;;  %v2617_v58 = vmin.u32 %v1059_v55, %v3595_v26  ;;  %v4755_v39 = vand.u32 2147483647, %v3513_v45 }
 0x113   : > { %v1211_v51 = vadd.s32 1, %v2624_v57  ;;  %2880 = vsinq.f32 %v3507_v4  ;;  %v3629_v20 = vadd.s32 3, %v874_v6  ;;  %v928_v9 = vsel %vm922_vm2, %v925_v12, %v927_v34 }
 0x114   : > { %v351_v52 = vmul.f32 %v3245_v49, %v292_v22  ;;  %v873_v61 = vsel %vm3479_vm0, %v3264_v14, %v870_v29  ;;  %v770_v48 = vsel %vm3582_vm14, 0, %v768_v56  ;;  %v1061_v47 = vclz %v2617_v58 }
 0x115   : > { %4808 = vst [vmem:[#allocation7_spill] sm:$0xff] %v3629_v20  ;;  %vm1212_vm15 = vcmp.gt.s32.totalorder %v1211_v51, 0  ;;  %v766_v4 = vsel %vm683_vm9, %v765_v5, %v764_v15  ;;  %vm946_vm3 = vc.u32 %v3615_v27, %v3617_v36  ;;  %v947_v46 = vadd.s32 1, %v3618_v62 }
 0x116   : > { %v1213_v6 = vsel %vm1212_vm15, %v1211_v51, 0  ;;  %v2618_v50 = vadd.s32 4294967294, %v1061_v47  ;;  %v944_v49 = vmul.u32 %v937_v11, %v928_v9  ;;  %v1208_v2 = vand.u32 8388607, %v4755_v39 }
 0x117   : > { %v1215_v13 = vand.u32 31, %v1213_v6  ;;  %2882 = vcosq.f32 %v873_v61  ;;  %v3646_v19 = vadd.s32 3, %v770_v48  ;;  %vm995_vm0 = vcmp.lt.s32.totalorder %v3420_v54, 0 }
 0x118   : > { %v948_v1 = vsel %vm946_vm3, %v947_v46, %v3618_v62  ;;  %2884 = vsinq.f32 %v873_v61  ;;  %vm2619_vm4 = vcmp.lt.s32.totalorder %v2618_v50, 0  ;;  %v3653_v11 = vsel %vm3582_vm14, %v3337_v3, %v766_v4 }
 0x119   : > { %v949_v15 = vadd.s32 %v948_v1, %v944_v49  ;;  %v1216_v38 = vsub.s32 32, %v1215_v13  ;;  %v1049_v17 = vadd.s32 %v3543_v30, %v3551_v43  ;;  %v1064_v24 = vsel %vm2619_vm4, 0, %v2618_v50 }
 0x11a   : > { %v1079_v10 = vsub.s32 4, %v3576_v42  ;;  %v1065_v29 = vsub.s32 32, %v1064_v24  ;;  %v1069_v56 = vsub.s32 4294967266, %v1064_v24  ;;  %v1209_v57 = vor.u32 8388608, %v1208_v2 }
 0x11b   : > { %v950_v31 = vadd.s32 536870912, %v949_v15  ;;  %v1219_v5 = vshrl.u32 %v4757_v18, %v1216_v38  ;;  %v1222_v55 = vshrl.u32 %v4769_v21, %v1216_v38  ;;  %v1225_v12 = vshrl.u32 %v4761_v23, %v1216_v38  ;;  %v3663_v40 = vpop.eup %2878 }
 0x11c   : > { %v3661_v34 = vadd.f32 %v410_v59, %v351_v52  ;;  %v1218_v30 = vshll.u32 %v4759_v16, %v1215_v13  ;;  %v1221_v43 = vshll.u32 %v4757_v18, %v1215_v13  ;;  %v1228_v35 = vshrl.u32 %v4776_v25, %v1216_v38 }
 0x11d   : > { %v3665_v22 = vshrl.u32 %v950_v31, 30  ;;  %v3670_v62 = vpop.eup %2880  ;;  %v1070_v58 = vadd.s32 127, %v1069_v56  ;;  %v1214_v51 = vshrl.u32 %v1213_v6, 5  ;;  %v1224_v9 = vshll.u32 %v4769_v21, %v1215_v13 }
 0x11e   : > { %v1227_v61 = vshll.u32 %v4761_v23, %v1215_v13  ;;  %v1067_v52 = vshrl.u32 %v1049_v17, %v1065_v29  ;;  %v1220_v47 = vor.u32 %v1219_v5, %v1218_v30  ;;  %v1223_v4 = vor.u32 %v1222_v55, %v1221_v43  ;;  %v307_v55 = vpop.permute.xlu1 %306 }
 0x11f   : > { %v952_v48 = vshll.u32 %v3665_v22, 30  ;;  %v1226_v46 = vor.u32 %v1225_v12, %v1224_v9  ;;  %v1230_v49 = vshll.u32 %v4776_v25, %v1215_v13  ;;  %v1231_v2 = vshrl.u32 %v4774_v32, %v1216_v38 }
 0x120   : > { %v1229_v50 = vor.u32 %v1228_v35, %v1227_v61  ;;  %vm3679_vm5 = vcmp.le.f32.partialorder %v993_v33, 0.7853982  ;;  %v1066_v6 = vshll.u32 %v3595_v26, %v1064_v24  ;;  %v1080_v59 = vsel %vm995_vm0, %v1079_v10, %v3576_v42 }
 0x121   : > { %v3687_v17 = vsub.s32 %v949_v15, %v952_v48  ;;  %v3689_v29 = vshll.u32 %v1209_v57, 8  ;;  %v3691_v56 = vpop.eup %2882  ;;  %v1071_v13 = vshll.u32 %v1070_v58, 23  ;;  %v1217_v31 = vshrl.u32 %v4759_v16, %v1216_v38 }
 0x122   : > { %4811 = vst [vmem:[#allocation8_spill] sm:$0xff] %v3691_v56  ;;  %v1232_v5 = vor.u32 %v1231_v2, %v1230_v49  ;;  %v1100_v33 = vand.u32 2139095040, %v3661_v34  ;;  %v3695_v12 = vpop.eup %2884  ;;  %v1068_v26 = vor.u32 %v1067_v52, %v1066_v6  ;;  %vm1233_vm6 = vcmp.lt.s32.totalorder %v1214_v51, 1 }
 0x123   : > { %4812 = vst [vmem:[#allocation9_spill] sm:$0xff] %v3695_v12  ;;  %v955_v24 = vsub.s32 0, %v3687_v17  ;;  %vm1236_vm7 = vcmp.lt.s32.totalorder %v1214_v51, 4  ;;  %vm1235_vm8 = vcmp.lt.s32.totalorder %v1214_v51, 3  ;;  %v1241_v15 = vsel %vm1233_vm6, %v1220_v47, %v1223_v4 }
 0x124   : > { %v1238_v42 = vsel %vm1236_vm7, %v1226_v46, 2102212464  ;;  %v1242_v10 = vsel %vm1236_vm7, %v1229_v50, 920167782  ;;  %vm1234_vm9 = vcmp.lt.s32.totalorder %v1214_v51, 2  ;;  %v1245_v38 = vsel %vm1233_vm6, %v1223_v4, %v1226_v46 }
 0x125   : > { %v2613_v57 = vmin.u32 %v955_v24, %v3687_v17  ;;  %v1243_v30 = vsel %vm1235_vm8, %v1226_v46, %v1242_v10  ;;  %v1072_v43 = vor.u32 4788187, %v1071_v13  ;;  %v1246_v58 = vsel %vm1236_vm7, %v1232_v5, 1326507024  ;;  %v3707_v46 = vpop.permute.xlu1 %424 }
 0x126   : > { %v1244_v35 = vsel %vm1234_vm9, %v1241_v15, %v1243_v30  ;;  %v1101_v9 = vshrl.u32 %v1100_v33, 23  ;;  %v1237_v52 = vsel %vm1233_vm6, %v1217_v31, %v1220_v47  ;;  %v1239_v48 = vsel %vm1235_vm8, %v1223_v4, %v1238_v42 }
 0x127   : > { %v957_v61 = vclz %v2613_v57  ;;  %v1247_v49 = vsel %vm1235_vm8, %v1229_v50, %v1246_v58  ;;  %vm891_vm11 = vcmp.lt.s32.totalorder %v3470_v37, 0  ;;  %v4756_v47 = vand.u32 2147483647, %v3661_v34 }
 0x128   : > { %v1248_v2 = vsel %vm1234_vm9, %v1245_v38, %v1247_v49  ;;  %v3703_v6 = vmul.u32.u64.low %v3689_v29, %v1244_v35  ;;  %v3704_v39 = vmul.u32.u64.high %v3689_v29, %v1244_v35, %v3703_v6  ;;  %v2620_v24 = vadd.s32 4294967169, %v1101_v9 }
 0x129   : > { %v2614_v13 = vadd.s32 4294967294, %v957_v61  ;;  %v3710_v5 = vmul.u32.u64.low %v3689_v29, %v1248_v2  ;;  %v3711_v33 = vmul.u32.u64.high %v3689_v29, %v1248_v2, %v3710_v5  ;;  %2886 = vcosq.f32 %v3653_v11  ;;  %v317_v51 = vpop.permute.xlu1 %316  ;;  %v3732_v2 = vld [vmem:[%s3242_s13] ss:$0 sm:$0xff] }
 0x12a   : > { %v1073_v4 = vand.u32 2147483647, %v1072_v43  ;;  %v1082_v50 = vsel %vm3679_vm5, 0, %v1080_v59  ;;  %v1107_v31 = vadd.s32 1, %v2620_v24  ;;  %2888 = vsinq.f32 %v3653_v11  ;;  %v302_v11 = vpop.permute.xlu0 %301 }
 0x12b   : > { %v945_v42 = vadd.s32 %v3617_v36, %v3615_v27  ;;  %vm2615_vm12 = vcmp.lt.s32.totalorder %v2614_v13, 0  ;;  %v1240_v15 = vsel %vm1234_vm9, %v1237_v52, %v1239_v48  ;;  %v1075_v10 = vcvt.s32.f32 %v1068_v26 }
 0x12c   : > { %v960_v57 = vsel %vm2615_vm12, 0, %v2614_v13  ;;  %v1259_v30 = vadd.s32 1, %v3704_v39  ;;  %vm1108_vm14 = vcmp.gt.s32.totalorder %v1107_v31, 0  ;;  %v975_v35 = vsub.s32 4, %v3665_v22 }
 0x12d   : > { %v961_v38 = vsub.s32 32, %v960_v57  ;;  %v965_v43 = vsub.s32 4294967266, %v960_v57  ;;  %v1104_v59 = vand.u32 8388607, %v4756_v47  ;;  %v1076_v58 = vmul.f32 %v1075_v10, %v1073_v4 }
 0x12e   : > { %v1256_v27 = vmul.u32 %v3689_v29, %v1240_v15  ;;  %vm1258_vm1 = vc.u32 %v3711_v33, %v3703_v6  ;;  %v1109_v36 = vsel %vm1108_vm14, %v1107_v31, 0  ;;  %v3728_v26 = vadd.s32 3, %v1082_v50 }
 0x12f   : > { %v963_v9 = vshrl.u32 %v945_v42, %v961_v38  ;;  %v966_v61 = vadd.s32 127, %v965_v43  ;;  %v1260_v52 = vsel %vm1258_vm1, %v1259_v30, %v3704_v39  ;;  %v1111_v49 = vand.u32 31, %v1109_v36 }
 0x130   : > { %4813 = vst [vmem:[#allocation10_spill] sm:$0xff] %v3728_v26  ;;  %v1261_v48 = vadd.s32 %v1260_v52, %v1256_v27  ;;  %v354_v24 = vmul.f32 %v3732_v2, %v307_v55  ;;  %v353_v13 = vmul.f32 %v3732_v2, %v302_v11  ;;  %v962_v29 = vshll.u32 %v3687_v17, %v960_v57 }
 0x131   : > { %v967_v5 = vshll.u32 %v966_v61, 23  ;;  %v3740_v4 = vsel %vm891_vm11, %v975_v35, %v3665_v22  ;;  %v3743_v50 = vmul.f32 %v3732_v2, %v317_v51  ;;  %v1077_v39 = vxor.u32 2147483648, %v1076_v58 }
 0x132   : > { %v1262_v31 = vadd.s32 536870912, %v1261_v48  ;;  %v1105_v42 = vor.u32 8388608, %v1104_v59  ;;  %v1112_v15 = vsub.s32 32, %v1111_v49  ;;  %v964_v10 = vor.u32 %v963_v9, %v962_v29 }
 0x133   : > { %v968_v30 = vor.u32 4788187, %v967_v5  ;;  %v3745_v55 = vshrl.u32 %v1109_v36, 5  ;;  %v1114_v38 = vshll.u32 %v4759_v16, %v1111_v49  ;;  %v3748_v17 = vpop.eup %2886  ;;  %v1117_v43 = vshll.u32 %v4757_v18, %v1111_v49  ;;  %v420_v5 = vpop.permute.xlu0 %419 }
 0x134   : > { %4814 = vst [vmem:[#allocation11_spill] sm:$0xff] %v3748_v17  ;;  %v3750_v57 = vshrl.u32 %v1262_v31, 30  ;;  %v1115_v22 = vshrl.u32 %v4757_v18, %v1112_v15  ;;  %v1118_v35 = vshrl.u32 %v4769_v21, %v1112_v15  ;;  %v3755_v11 = vpop.eup %2888  ;;  %v1121_v27 = vshrl.u32 %v4761_v23, %v1112_v15 }
 0x135   : > { %v969_v59 = vand.u32 2147483647, %v968_v30  ;;  %v1123_v36 = vshll.u32 %v4761_v23, %v1111_v49  ;;  %v1124_v51 = vshrl.u32 %v4776_v25, %v1112_v15  ;;  %v1120_v29 = vshll.u32 %v4769_v21, %v1111_v49 }
 0x136   : > { %v1264_v9 = vshll.u32 %v3750_v57, 30  ;;  %v1116_v61 = vor.u32 %v1115_v22, %v1114_v38  ;;  %v1119_v52 = vor.u32 %v1118_v35, %v1117_v43  ;;  %v971_v31 = vcvt.s32.f32 %v964_v10 }
 0x137   : > { %v1125_v47 = vor.u32 %v1124_v51, %v1123_v36  ;;  %v1126_v18 = vshll.u32 %v4776_v25, %v1111_v49  ;;  %v1127_v16 = vshrl.u32 %v4774_v32, %v1112_v15  ;;  %v1078_v30 = vsel %vm995_vm0, %v1077_v39, %v1076_v58 }
 0x138   : > { %vm3768_vm2 = vcmp.le.f32.partialorder %v889_v8, 0.7853982  ;;  %v3772_v38 = vsub.s32 %v1261_v48, %v1264_v9  ;;  %v1122_v22 = vor.u32 %v1121_v27, %v1120_v29  ;;  %v3775_v43 = vadd.f32 %v3707_v46, %v354_v24 }
 0x139   : > { %v972_v10 = vmul.f32 %v971_v31, %v969_v59  ;;  %v1128_v35 = vor.u32 %v1127_v16, %v1126_v18  ;;  %vm1129_vm15 = vcmp.lt.s32.totalorder %v3745_v55, 1  ;;  %v3778_v49 = vadd.f32 %v420_v5, %v353_v13  ;;  %v312_v31 = vpop.permute.xlu0 %311 }
 0x13a   : > { %4817 = vst [vmem:[#allocation12_spill] sm:$0xff] %v3775_v43  ;;  %v1267_v58 = vsub.s32 0, %v3772_v38  ;;  %vm1132_vm3 = vcmp.lt.s32.totalorder %v3745_v55, 4  ;;  %v1137_v8 = vsel %vm1129_vm15, %v1116_v61, %v1119_v52  ;;  %v1145_v39 = vshll.u32 %v1105_v42, 8 }
 0x13b   : > { %v4818_v48 = vmov 683565275   ;;  %vm1130_vm0 = vcmp.lt.s32.totalorder %v3745_v55, 2  ;;  %vm1131_vm4 = vcmp.lt.s32.totalorder %v3745_v55, 3  ;;  %v1138_v46 = vsel %vm1132_vm3, %v1125_v47, 920167782 }
 0x13c   : > { %v1113_v36 = vshrl.u32 %v4818_v48, %v1112_v15  ;;  %v2625_v16 = vmin.u32 %v1267_v58, %v3772_v38  ;;  %v1134_v18 = vsel %vm1132_vm3, %v1122_v22, 2102212464  ;;  %v1139_v24 = vsel %vm1131_vm4, %v1122_v22, %v1138_v46 }
 0x13d   : > { %v1141_v13 = vsel %vm1129_vm15, %v1119_v52, %v1122_v22  ;;  %v973_v59 = vxor.u32 2147483648, %v972_v10  ;;  %vm1203_vm6 = vcmp.lt.s32.totalorder %v3513_v45, 0  ;;  %v1140_v42 = vsel %vm1130_vm0, %v1137_v8, %v1139_v24 }
 0x13e   : > { %v1142_v15 = vsel %vm1132_vm3, %v1128_v35, 1326507024  ;;  %v4763_v27 = vand.u32 2147483647, %v3775_v43  ;;  %v1269_v51 = vclz %v2625_v16  ;;  %v1133_v9 = vsel %vm1129_vm15, %v1113_v36, %v1116_v61 }
 0x13f   : > { %v1143_v29 = vsel %vm1131_vm4, %v1125_v47, %v1142_v15  ;;  %v1412_v5 = vand.u32 2139095040, %v3775_v43  ;;  %v1135_v22 = vsel %vm1131_vm4, %v1119_v52, %v1134_v18  ;;  %v1081_v47 = vsel %vm3679_vm5, %v3420_v54, %v1078_v30 }
 0x140   : > { %v1144_v58 = vsel %vm1130_vm0, %v1141_v13, %v1143_v29  ;;  %v3805_v8 = vmul.u32.u64.low %v1145_v39, %v1140_v42  ;;  %v3806_v35 = vmul.u32.u64.high %v1145_v39, %v1140_v42, %v3805_v8  ;;  %v2626_v46 = vadd.s32 4294967294, %v1269_v51 }
 0x141   : > { %v3808_v16 = vmul.u32.u64.low %v1145_v39, %v1144_v58  ;;  %v3809_v24 = vmul.u32.u64.high %v1145_v39, %v1144_v58, %v3808_v16  ;;  %v1413_v61 = vshrl.u32 %v1412_v5, 23  ;;  %v978_v36 = vsel %vm3768_vm2, 0, %v3740_v4  ;;  %v435_v4 = vpop.permute.xlu1 %434 }
 0x142   : > { %v4819_v52 = vand.u32 2147483647, %v3513_v45  ;;  %v1287_v13 = vsub.s32 4, %v3750_v57  ;;  %v3825_v42 = vmul.f32 %v3732_v2, %v312_v31  ;;  %v974_v15 = vsel %vm891_vm11, %v973_v59, %v972_v10 }
 0x143   : > { %vm2627_vm8 = vcmp.lt.s32.totalorder %v2626_v46, 0  ;;  %v1136_v1 = vsel %vm1130_vm0, %v1133_v9, %v1135_v22  ;;  %v2632_v30 = vadd.s32 4294967169, %v1413_v61  ;;  %v1155_v29 = vadd.s32 1, %v3806_v35 }
 0x144   : > { %vm3819_vm7 = vcmp.le.f32.partialorder %v4819_v52, 0.7853982  ;;  %v1272_v51 = vsel %vm2627_vm8, 0, %v2626_v46  ;;  %v1416_v5 = vand.u32 8388607, %v4763_v27  ;;  %v1308_v58 = vand.u32 2139095040, %v3778_v49 }
 0x145   : > { %2890 = vcosq.f32 %v1081_v47  ;;  %v1273_v31 = vsub.s32 32, %v1272_v51  ;;  %v1277_v16 = vsub.s32 4294967266, %v1272_v51  ;;  %v4764_v52 = vand.u32 2147483647, %v3778_v49 }
 0x146   : > { %v1152_v10 = vmul.u32 %v1145_v39, %v1136_v1  ;;  %vm1154_vm5 = vc.u32 %v3809_v24, %v3805_v8  ;;  %v1419_v55 = vadd.s32 1, %v2632_v30  ;;  %v3838_v59 = vadd.f32 %v435_v4, %v3743_v50 }
 0x147   : > { %v3843_v9 = vsel %vm3768_vm2, %v3470_v37, %v974_v15  ;;  %v1257_v22 = vadd.s32 %v3703_v6, %v3711_v33  ;;  %v3850_v46 = vsel %vm1203_vm6, %v1287_v13, %v3750_v57  ;;  %v1156_v39 = vsel %vm1154_vm5, %v1155_v29, %v3806_v35 }
 0x148   : > { %v1157_v61 = vadd.s32 %v1156_v39, %v1152_v10  ;;  %v1417_v1 = vor.u32 8388608, %v1416_v5  ;;  %vm1420_vm9 = vcmp.gt.s32.totalorder %v1419_v55, 0  ;;  %v1309_v50 = vshrl.u32 %v1308_v58, 23 }
 0x149   : > { %v1275_v30 = vshrl.u32 %v1257_v22, %v1273_v31  ;;  %v1278_v4 = vadd.s32 127, %v1277_v16  ;;  %v1421_v27 = vsel %vm1420_vm9, %v1419_v55, 0  ;;  %v3855_v23 = vand.u32 8388607, %v4764_v52 }
 0x14a   : > { %2892 = vsinq.f32 %v1081_v47  ;;  %v3857_v6 = vadd.s32 3, %v978_v36  ;;  %v1158_v33 = vadd.s32 536870912, %v1157_v61  ;;  %v1423_v15 = vand.u32 31, %v1421_v27 }
 0x14b   : > { %2894 = vcosq.f32 %v3843_v9  ;;  %v1274_v57 = vshll.u32 %v3772_v38, %v1272_v51  ;;  %v3866_v29 = vadd.s32 %v3805_v8, %v3809_v24  ;;  %v3870_v36 = vshll.u32 %v1417_v1, 8 }
 0x14c   : > { %4822 = vst [vmem:[#allocation13_spill] sm:$0xff] %v3857_v6  ;;  %v3868_v5 = vshrl.u32 %v1158_v33, 30  ;;  %v1424_v47 = vsub.s32 32, %v1423_v15  ;;  %v1279_v31 = vshll.u32 %v1278_v4, 23  ;;  %v2628_v16 = vadd.s32 4294967169, %v1309_v50 }
 0x14d   : > { %v3872_v58 = vor.u32 %v1275_v30, %v1274_v57  ;;  %v1313_v38 = vor.u32 8388608, %v3855_v23  ;;  %v1426_v10 = vshll.u32 %v4818_v48, %v1423_v15  ;;  %v4823_v55 = vmov 2475754826  }
 0x14e   : > { %v1160_v51 = vshll.u32 %v3868_v5, 30  ;;  %v1427_v22 = vshrl.u32 %v4823_v55, %v1424_v47  ;;  %v1429_v8 = vshll.u32 %v4823_v55, %v1423_v15  ;;  %v1430_v39 = vshrl.u32 %v4769_v21, %v1424_v47 }
 0x14f   : > { %v3879_v24 = vpop.eup %2890  ;;  %v1432_v1 = vshll.u32 %v4769_v21, %v1423_v15  ;;  %v4825_v30 = vmov 2102212464   ;;  %v1436_v50 = vshrl.u32 %v4776_v25, %v1424_v47  ;;  %v1422_v23 = vshrl.u32 %v1421_v27, 5 }
 0x150   : > { %4824 = vst [vmem:[#allocation14_spill] sm:$0xff] %v3879_v24  ;;  %v1433_v33 = vshrl.u32 %v4825_v30, %v1424_v47  ;;  %v3885_v4 = vsub.s32 %v1157_v61, %v1160_v51  ;;  %v1435_v57 = vshll.u32 %v4825_v30, %v1423_v15  ;;  %v1439_v52 = vshrl.u32 %v4774_v32, %v1424_v47 }
 0x151   : > { %v1428_v13 = vor.u32 %v1427_v22, %v1426_v10  ;;  %v1431_v35 = vor.u32 %v1430_v39, %v1429_v8  ;;  %v1438_v24 = vshll.u32 %v4776_v25, %v1423_v15  ;;  %v1315_v21 = vadd.s32 1, %v2628_v16 }
 0x152   : > { %v1434_v54 = vor.u32 %v1433_v33, %v1432_v1  ;;  %v1163_v26 = vsub.s32 0, %v3885_v4  ;;  %v1437_v37 = vor.u32 %v1436_v50, %v1435_v57  ;;  %v1620_v6 = vand.u32 2139095040, %v3838_v59 }
 0x153   : > { %v1280_v56 = vor.u32 4788187, %v1279_v31  ;;  %v1283_v61 = vcvt.s32.f32 %v3872_v58  ;;  %v1425_v27 = vshrl.u32 %v4818_v48, %v1424_v47  ;;  %v1440_v51 = vor.u32 %v1439_v52, %v1438_v24 }
 0x154   : > { %v3894_v14 = vpop.eup %2892  ;;  %vm1099_vm11 = vcmp.lt.s32.totalorder %v3661_v34, 0  ;;  %v2621_v10 = vmin.u32 %v1163_v26, %v3885_v4  ;;  %vm1441_vm12 = vcmp.lt.s32.totalorder %v1422_v23, 1  ;;  %vm1442_vm14 = vcmp.lt.s32.totalorder %v1422_v23, 2 }
 0x155   : > { %4826 = vst [vmem:[#allocation15_spill] sm:$0xff] %v3894_v14  ;;  %vm1444_vm1 = vcmp.lt.s32.totalorder %v1422_v23, 4  ;;  %v3898_v15 = vpop.eup %2894  ;;  %vm1443_vm2 = vcmp.lt.s32.totalorder %v1422_v23, 3  ;;  %v1449_v22 = vsel %vm1441_vm12, %v1428_v13, %v1431_v35  ;;  %v1445_v58 = vsel %vm1441_vm12, %v1425_v27, %v1428_v13 }
 0x156   : > { %4827 = vst [vmem:[#allocation16_spill] sm:$0xff] %v3898_v15  ;;  %v1446_v16 = vsel %vm1444_vm1, %v1434_v54, 2102212464  ;;  %v1450_v31 = vsel %vm1444_vm1, %v1437_v37, 920167782  ;;  %v1165_v8 = vclz %v2621_v10  ;;  %v1453_v1 = vsel %vm1441_vm12, %v1431_v35, %v1434_v54 }
 0x157   : > { %v1447_v39 = vsel %vm1443_vm2, %v1431_v35, %v1446_v16  ;;  %v1451_v47 = vsel %vm1443_vm2, %v1434_v54, %v1450_v31  ;;  %v1281_v52 = vand.u32 2147483647, %v1280_v56  ;;  %v1454_v33 = vsel %vm1444_vm1, %v1440_v51, 1326507024 }
 0x158   : > { %v1452_v24 = vsel %vm1442_vm14, %v1449_v22, %v1451_v47  ;;  %v2622_v50 = vadd.s32 4294967294, %v1165_v8  ;;  %v1455_v26 = vsel %vm1443_vm2, %v1437_v37, %v1454_v33  ;;  %v1183_v25 = vsub.s32 4, %v3868_v5 }
 0x159   : > { %v3902_v57 = vmul.u32.u64.low %v3870_v36, %v1452_v24  ;;  %v3903_v32 = vmul.u32.u64.high %v3870_v36, %v1452_v24, %v3902_v57  ;;  %v1448_v14 = vsel %vm1442_vm14, %v1445_v58, %v1447_v39  ;;  %v1456_v13 = vsel %vm1442_vm14, %v1453_v1, %v1455_v26 }
 0x15a   : > { %vm1316_vm15 = vcmp.gt.s32.totalorder %v1315_v21, 0  ;;  %vm2623_vm3 = vcmp.lt.s32.totalorder %v2622_v50, 0  ;;  %v3910_v56 = vmul.u32.u64.low %v3870_v36, %v1456_v13  ;;  %v3911_v27 = vmul.u32.u64.high %v3870_v36, %v1456_v13, %v3910_v56 }
 0x15b   : > { %v1317_v54 = vsel %vm1316_vm15, %v1315_v21, 0  ;;  %v1168_v35 = vsel %vm2623_vm3, 0, %v2622_v50  ;;  %v3913_v51 = vshll.u32 %v1313_v38, 8  ;;  %v1621_v10 = vshrl.u32 %v1620_v6, 23 }
 0x15c   : > { %v1319_v37 = vand.u32 31, %v1317_v54  ;;  %v1284_v16 = vmul.f32 %v1283_v61, %v1281_v52  ;;  %v1169_v22 = vsub.s32 32, %v1168_v35  ;;  %v1173_v31 = vsub.s32 4294967266, %v1168_v35 }
 0x15d   : > { %v1467_v8 = vadd.s32 1, %v3903_v32  ;;  %v1170_v23 = vshll.u32 %v3885_v4, %v1168_v35  ;;  %v3920_v58 = vsel %vm1099_vm11, %v1183_v25, %v3868_v5  ;;  %v1464_v39 = vmul.u32 %v3870_v36, %v1448_v14 }
 0x15e   : > { %v1320_v21 = vsub.s32 32, %v1319_v37  ;;  %v1171_v47 = vshrl.u32 %v3866_v29, %v1169_v22  ;;  %v1174_v38 = vadd.s32 127, %v1173_v31  ;;  %vm1466_vm0 = vc.u32 %v3911_v27, %v3902_v57 }
 0x15f   : > { %v1322_v6 = vshll.u32 %v4818_v48, %v1319_v37  ;;  %v1468_v61 = vsel %vm1466_vm0, %v1467_v8, %v3903_v32  ;;  %v4828_v52 = vmov 2131351028   ;;  %v1318_v29 = vshrl.u32 %v1317_v54, 5 }
 0x160   : > { %v1323_v4 = vshrl.u32 %v4823_v55, %v1320_v21  ;;  %v1326_v24 = vshrl.u32 %v4828_v52, %v1320_v21  ;;  %v1328_v25 = vshll.u32 %v4828_v52, %v1319_v37  ;;  %v1172_v5 = vor.u32 %v1171_v47, %v1170_v23 }
 0x161   : > { %v1175_v1 = vshll.u32 %v1174_v38, 23  ;;  %v1469_v14 = vadd.s32 %v1468_v61, %v1464_v39  ;;  %v1329_v36 = vshrl.u32 %v4825_v30, %v1320_v21  ;;  %v1325_v33 = vshll.u32 %v4823_v55, %v1319_v37 }
 0x162   : > { %v1331_v50 = vshll.u32 %v4825_v30, %v1319_v37  ;;  %v4829_v26 = vmov 920167782   ;;  %vm1411_vm4 = vcmp.lt.s32.totalorder %v3775_v43, 0  ;;  %v1324_v35 = vor.u32 %v1323_v4, %v1322_v6 }
 0x163   : > { %v1332_v13 = vshrl.u32 %v4829_v26, %v1320_v21  ;;  %v1176_v56 = vor.u32 4788187, %v1175_v1  ;;  %v1470_v32 = vadd.s32 536870912, %v1469_v14  ;;  %v1330_v22 = vor.u32 %v1329_v36, %v1328_v25 }
 0x164   : > { %v1327_v31 = vor.u32 %v1326_v24, %v1325_v33  ;;  %v1334_v23 = vshll.u32 %v4829_v26, %v1319_v37  ;;  %v4830_v39 = vmov 1326507024   ;;  %v1285_v38 = vxor.u32 2147483648, %v1284_v16 }
 0x165   : > { %v1333_v8 = vor.u32 %v1332_v13, %v1331_v50  ;;  %v1335_v47 = vshrl.u32 %v4830_v39, %v1320_v21  ;;  %v1177_v54 = vand.u32 2147483647, %v1176_v56  ;;  %v1179_v61 = vcvt.s32.f32 %v1172_v5 }
 0x166   : > { %v1471_v15 = vshrl.u32 %v1470_v32, 30  ;;  %v4831_v12 = vand.u32 2147483647, %v3661_v34  ;;  %v1321_v1 = vshrl.u32 %v4818_v48, %v1320_v21  ;;  %vm1340_vm5 = vcmp.lt.s32.totalorder %v1318_v29, 4 }
 0x167   : > { %v1336_v6 = vor.u32 %v1335_v47, %v1334_v23  ;;  %v2640_v4 = vadd.s32 4294967169, %v1621_v10  ;;  %v1180_v24 = vmul.f32 %v1179_v61, %v1177_v54  ;;  %vm1337_vm9 = vcmp.lt.s32.totalorder %v1318_v29, 1 }
 0x168   : > { %vm3940_vm8 = vcmp.le.f32.partialorder %v4831_v12, 0.7853982  ;;  %v1472_v25 = vshll.u32 %v1471_v15, 30  ;;  %v1342_v37 = vsel %vm1340_vm5, %v1330_v22, 2102212464  ;;  %v1495_v36 = vsub.s32 4, %v1471_v15 }
 0x169   : > { %v1345_v33 = vsel %vm1337_vm9, %v1324_v35, %v1327_v31  ;;  %v1346_v50 = vsel %vm1340_vm5, %v1333_v8, 920167782  ;;  %v1350_v5 = vsel %vm1340_vm5, %v1336_v6, 1326507024  ;;  %vm1338_vm12 = vcmp.lt.s32.totalorder %v1318_v29, 2 }
 0x16a   : > { %v3945_v13 = vsub.s32 %v1469_v14, %v1472_v25  ;;  %vm1339_vm14 = vcmp.lt.s32.totalorder %v1318_v29, 3  ;;  %v1349_v12 = vsel %vm1337_vm9, %v1327_v31, %v1330_v22  ;;  %v1341_v56 = vsel %vm1337_vm9, %v1321_v1, %v1324_v35 }
 0x16b   : > { %v1343_v32 = vsel %vm1339_vm14, %v1327_v31, %v1342_v37  ;;  %v1347_v17 = vsel %vm1339_vm14, %v1330_v22, %v1346_v50  ;;  %v1351_v21 = vsel %vm1339_vm14, %v1333_v8, %v1350_v5  ;;  %v1286_v10 = vsel %vm1203_vm6, %v1285_v38, %v1284_v16 }
 0x16c   : > { %v1181_v23 = vxor.u32 2147483648, %v1180_v24  ;;  %v1475_v47 = vsub.s32 0, %v3945_v13  ;;  %v1348_v54 = vsel %vm1338_vm12, %v1345_v33, %v1347_v17  ;;  %v1496_v61 = vsel %vm1411_vm4, %v1495_v36, %v1471_v15 }
 0x16d   : > { %v1352_v6 = vsel %vm1338_vm12, %v1349_v12, %v1351_v21  ;;  %v3953_v14 = vmul.u32.u64.low %v3913_v51, %v1348_v54  ;;  %v3954_v25 = vmul.u32.u64.high %v3913_v51, %v1348_v54, %v3953_v14  ;;  %v1344_v35 = vsel %vm1338_vm12, %v1341_v56, %v1343_v32 }
 0x16e   : > { %v2633_v29 = vmin.u32 %v1475_v47, %v3945_v13  ;;  %v3959_v22 = vmul.u32.u64.low %v3913_v51, %v1352_v6  ;;  %v3960_v31 = vmul.u32.u64.high %v3913_v51, %v1352_v6, %v3959_v22  ;;  %2896 = vsinq.f32 %v3843_v9 }
 0x16f   : > { %v4834_v17 = vsel %vm3819_vm7, 0, %v3850_v46  ;;  %v4836_v16 = vand.u32 2147483647, %v3775_v43  ;;  %v1627_v38 = vadd.s32 1, %v2640_v4  ;;  %v1289_v1 = vsel %vm3819_vm7, %v3513_v45, %v1286_v10  ;;  %v430_v10 = vpop.permute.xlu0 %429 }
 0x170   : > { %v3967_v15 = vadd.s32 3, %v4834_v17  ;;  %v1186_v9 = vsel %vm3940_vm8, 0, %v3920_v58  ;;  %v1477_v37 = vclz %v2633_v29  ;;  %v4839_v46 = vand.u32 2147483647, %v3838_v59 }
 0x171   : > { %vm3971_vm6 = vcmp.le.f32.partialorder %v4836_v16, 0.7853982  ;;  %v1360_v50 = vmul.u32 %v3913_v51, %v1344_v35  ;;  %v1363_v5 = vadd.s32 1, %v3954_v25  ;;  %vm1628_vm1 = vcmp.gt.s32.totalorder %v1627_v38, 0 }
 0x172   : > { %4835 = vst [vmem:[#allocation17_spill] sm:$0xff] %v3967_v15  ;;  %v1624_v36 = vand.u32 8388607, %v4839_v46  ;;  %v1498_v33 = vsel %vm3971_vm6, 0, %v1496_v61  ;;  %v1182_v18 = vsel %vm1099_vm11, %v1181_v23, %v1180_v24  ;;  %v2634_v4 = vadd.s32 4294967294, %v1477_v37 }
 0x173   : > { %vm1362_vm7 = vc.u32 %v3960_v31, %v3953_v14  ;;  %v1629_v58 = vsel %vm1628_vm1, %v1627_v38, 0  ;;  %2898 = vcosq.f32 %v1289_v1  ;;  %v3991_v12 = vadd.s32 3, %v1186_v9 }
 0x174   : > { %v1364_v56 = vsel %vm1362_vm7, %v1363_v5, %v3954_v25  ;;  %v1631_v32 = vand.u32 31, %v1629_v58  ;;  %2900 = vsinq.f32 %v1289_v1  ;;  %v1465_v51 = vadd.s32 %v3902_v57, %v3911_v27 }
 0x175   : > { %vm2635_vm2 = vcmp.lt.s32.totalorder %v2634_v4, 0  ;;  %v1365_v21 = vadd.s32 %v1364_v56, %v1360_v50  ;;  %v3999_v24 = vsel %vm3940_vm8, %v3661_v34, %v1182_v18  ;;  %v4001_v47 = vadd.s32 3, %v1498_v33 }
 0x176   : > { %v1480_v23 = vsel %vm2635_vm2, 0, %v2634_v4  ;;  %v1632_v54 = vsub.s32 32, %v1631_v32  ;;  %v1625_v29 = vor.u32 8388608, %v1624_v36  ;;  %v4003_v35 = vshrl.u32 %v1629_v58, 5 }
 0x177   : > { %4840 = vst [vmem:[#allocation18_spill] sm:$0xff] %v4001_v47  ;;  %v1481_v61 = vsub.s32 32, %v1480_v23  ;;  %v1485_v6 = vsub.s32 4294967266, %v1480_v23  ;;  %v1366_v25 = vadd.s32 536870912, %v1365_v21  ;;  %v4008_v22 = vadd.f32 %v430_v10, %v3825_v42 }
 0x178   : > { %v1635_v57 = vshrl.u32 %v4823_v55, %v1632_v54  ;;  %v1638_v27 = vshrl.u32 %v4828_v52, %v1632_v54  ;;  %v1634_v16 = vshll.u32 %v4818_v48, %v1631_v32  ;;  %v1641_v38 = vshrl.u32 %v4825_v30, %v1632_v54  ;;  %v4014_v1 = vpop.eup %2896 }
 0x179   : > { %v1486_v20 = vadd.s32 127, %v1485_v6  ;;  %v4010_v17 = vshrl.u32 %v1366_v25, 30  ;;  %v1482_v9 = vshll.u32 %v3945_v13, %v1480_v23  ;;  %v1637_v37 = vshll.u32 %v4823_v55, %v1631_v32  ;;  %v327_v25 = vpop.permute.xlu1 %326 }
 0x17a   : > { %v1640_v46 = vshll.u32 %v4828_v52, %v1631_v32  ;;  %v1644_v36 = vshrl.u32 %v4829_v26, %v1632_v54  ;;  %v1483_v33 = vshrl.u32 %v1465_v51, %v1481_v61  ;;  %v1643_v5 = vshll.u32 %v4825_v30, %v1631_v32 }
 0x17b   : > { %v1487_v42 = vshll.u32 %v1486_v20, 23  ;;  %v1368_v50 = vshll.u32 %v4010_v17, 30  ;;  %v1636_v18 = vor.u32 %v1635_v57, %v1634_v16  ;;  %v1639_v4 = vor.u32 %v1638_v27, %v1637_v37 }
 0x17c   : > { %v1646_v58 = vshll.u32 %v4829_v26, %v1631_v32  ;;  %v1647_v56 = vshrl.u32 %v4830_v39, %v1632_v54  ;;  %v1642_v23 = vor.u32 %v1641_v38, %v1640_v46  ;;  %v1645_v6 = vor.u32 %v1644_v36, %v1643_v5 }
 0x17d   : > { %v1488_v10 = vor.u32 4788187, %v1487_v42  ;;  %v4024_v13 = vsub.s32 %v1365_v21, %v1368_v50  ;;  %v4026_v47 = vpop.eup %2898  ;;  %2902 = vcosq.f32 %v3999_v24  ;;  %v4029_v61 = vshll.u32 %v1625_v29, 8 }
 0x17e   : > { %4841 = vst [vmem:[#allocation19_spill] sm:$0xff] %v4026_v47  ;;  %v1648_v51 = vor.u32 %v1647_v56, %v1646_v58  ;;  %v1516_v57 = vand.u32 2139095040, %v4008_v22  ;;  %v4032_v27 = vpop.eup %2900  ;;  %v1484_v32 = vor.u32 %v1483_v33, %v1482_v9  ;;  %v1633_v21 = vshrl.u32 %v4818_v48, %v1632_v54  ;;  %v445_v56 = vpop.permute.xlu1 %444 }
 0x17f   : > { %4842 = vst [vmem:[#allocation20_spill] sm:$0xff] %v4032_v27  ;;  %v1371_v20 = vsub.s32 0, %v4024_v13  ;;  %vm1649_vm11 = vcmp.lt.s32.totalorder %v4003_v35, 1  ;;  %v1489_v16 = vand.u32 2147483647, %v1488_v10  ;;  %vm1650_vm15 = vcmp.lt.s32.totalorder %v4003_v35, 2 }
 0x180   : > { %vm1652_vm3 = vcmp.lt.s32.totalorder %v4003_v35, 4  ;;  %v1657_v38 = vsel %vm1649_vm11, %v1636_v18, %v1639_v4  ;;  %vm1651_vm0 = vcmp.lt.s32.totalorder %v4003_v35, 3  ;;  %v1661_v9 = vsel %vm1649_vm11, %v1639_v4, %v1642_v23 }
 0x181   : > { %v2629_v29 = vmin.u32 %v1371_v20, %v4024_v13  ;;  %v1654_v37 = vsel %vm1652_vm3, %v1642_v23, 2102212464  ;;  %v1658_v46 = vsel %vm1652_vm3, %v1645_v6, 920167782  ;;  %v1662_v33 = vsel %vm1652_vm3, %v1648_v51, 1326507024 }
 0x182   : > { %v1659_v36 = vsel %vm1651_vm0, %v1642_v23, %v1658_v46  ;;  %v1517_v42 = vshrl.u32 %v1516_v57, 23  ;;  %v1491_v50 = vcvt.s32.f32 %v1484_v32  ;;  %v1653_v5 = vsel %vm1649_vm11, %v1633_v21, %v1636_v18  ;;  %v337_v35 = vpop.permute.xlu1 %336 }
 0x183   : > { %v1373_v54 = vclz %v2629_v29  ;;  %v1660_v58 = vsel %vm1650_vm15, %v1657_v38, %v1659_v36  ;;  %vm1307_vm8 = vcmp.lt.s32.totalorder %v3778_v49, 0  ;;  %v1655_v10 = vsel %vm1651_vm0, %v1639_v4, %v1654_v37  ;;  %v322_v36 = vpop.permute.xlu0 %321 }
 0x184   : > { %v1663_v47 = vsel %vm1651_vm0, %v1645_v6, %v1662_v33  ;;  %v4045_v20 = vmul.u32.u64.low %v4029_v61, %v1660_v58  ;;  %v4046_v45 = vmul.u32.u64.high %v4029_v61, %v1660_v58, %v4045_v20  ;;  %v1492_v46 = vmul.f32 %v1491_v50, %v1489_v16 }
 0x185   : > { %v2630_v23 = vadd.s32 4294967294, %v1373_v54  ;;  %v1664_v51 = vsel %vm1650_vm15, %v1661_v9, %v1663_v47  ;;  %v2636_v57 = vadd.s32 4294967169, %v1517_v42  ;;  %2904 = vsinq.f32 %v3999_v24 }
 0x186   : > { %v4053_v18 = vmul.u32.u64.low %v4029_v61, %v1664_v51  ;;  %v4054_v32 = vmul.u32.u64.high %v4029_v61, %v1664_v51, %v4053_v18  ;;  %v4785_v4 = vand.u32 2147483647, %v4008_v22  ;;  %v1656_v6 = vsel %vm1650_vm15, %v1653_v5, %v1655_v10  ;;  %v455_v54 = vpop.permute.xlu1 %454 }
 0x187   : > { %vm2631_vm5 = vcmp.lt.s32.totalorder %v2630_v23, 0  ;;  %v1523_v21 = vadd.s32 1, %v2636_v57  ;;  %v358_v16 = vmul.f32 %v3732_v2, %v327_v25  ;;  %v4060_v38 = vpop.eup %2902  ;;  %v1361_v47 = vadd.s32 %v3953_v14, %v3960_v31 }
 0x188   : > { %4843 = vst [vmem:[#allocation21_spill] sm:$0xff] %v4060_v38  ;;  %v1376_v29 = vsel %vm2631_vm5, 0, %v2630_v23  ;;  %v1391_v24 = vsub.s32 4, %v4010_v17  ;;  %v1675_v37 = vadd.s32 1, %v4046_v45  ;;  %v1493_v9 = vxor.u32 2147483648, %v1492_v46 }
 0x189   : > { %v1377_v33 = vsub.s32 32, %v1376_v29  ;;  %v1381_v42 = vsub.s32 4294967266, %v1376_v29  ;;  %vm1524_vm9 = vcmp.gt.s32.totalorder %v1523_v21, 0  ;;  %v1672_v50 = vmul.u32 %v4029_v61, %v1656_v6 }
 0x18a   : > { %vm1674_vm12 = vc.u32 %v4054_v32, %v4045_v20  ;;  %v1520_v25 = vand.u32 8388607, %v4785_v4  ;;  %v1525_v14 = vsel %vm1524_vm9, %v1523_v21, 0  ;;  %v4844_v31 = vand.u32 2147483647, %v3778_v49 }
 0x18b   : > { %v1379_v5 = vshrl.u32 %v1361_v47, %v1377_v33  ;;  %v1382_v58 = vadd.s32 127, %v1381_v42  ;;  %v1676_v10 = vsel %vm1674_vm12, %v1675_v37, %v4046_v45  ;;  %v4079_v23 = vmul.f32 %v3732_v2, %v322_v36 }
 0x18c   : > { %vm4073_vm14 = vcmp.le.f32.partialorder %v4844_v31, 0.7853982  ;;  %v1378_v61 = vshll.u32 %v4024_v13, %v1376_v29  ;;  %v1677_v51 = vadd.s32 %v1676_v10, %v1672_v50  ;;  %v1527_v57 = vand.u32 31, %v1525_v14 }
 0x18d   : > { %v4083_v18 = vmul.f32 %v3732_v2, %v337_v35  ;;  %v1494_v6 = vsel %vm1411_vm4, %v1493_v9, %v1492_v46  ;;  %v1383_v21 = vshll.u32 %v1382_v58, 23  ;;  %v1392_v47 = vsel %vm1307_vm8, %v1391_v24, %v4010_v17 }
 0x18e   : > { %v4090_v33 = vadd.f32 %v445_v56, %v358_v16  ;;  %v1380_v45 = vor.u32 %v1379_v5, %v1378_v61  ;;  %v1678_v37 = vadd.s32 536870912, %v1677_v51  ;;  %v1521_v36 = vor.u32 8388608, %v1520_v25 }
 0x18f   : > { %v1528_v42 = vsub.s32 32, %v1527_v57  ;;  %v1384_v13 = vor.u32 4788187, %v1383_v21  ;;  %v4092_v29 = vshrl.u32 %v1525_v14, 5  ;;  %v1530_v35 = vshll.u32 %v4818_v48, %v1527_v57  ;;  %v4096_v31 = vpop.eup %2904 }
 0x190   : > { %v1533_v50 = vshll.u32 %v4823_v55, %v1527_v57  ;;  %4847 = vst [vmem:[#allocation22_spill] sm:$0xff] %v4096_v31  ;;  %vm1619_vm4 = vcmp.lt.s32.totalorder %v3838_v59, 0  ;;  %v1679_v46 = vshrl.u32 %v1678_v37, 30  ;;  %v1536_v16 = vshll.u32 %v4828_v52, %v1527_v57 }
 0x191   : > { %v1531_v17 = vshrl.u32 %v4823_v55, %v1528_v42  ;;  %v1534_v56 = vshrl.u32 %v4828_v52, %v1528_v42  ;;  %v1385_v24 = vand.u32 2147483647, %v1384_v13  ;;  %v1537_v9 = vshrl.u32 %v4825_v30, %v1528_v42 }
 0x192   : > { %v1539_v25 = vshll.u32 %v4825_v30, %v1527_v57  ;;  %v1540_v14 = vshrl.u32 %v4829_v26, %v1528_v42  ;;  %v1387_v5 = vcvt.s32.f32 %v1380_v45  ;;  %v1680_v58 = vshll.u32 %v1679_v46, 30  ;;  %v2867_v45 = vld [vmem:[%s4752_s3 + $0x20] sm:$0xff]  }
 0x193   : > { %v1532_v10 = vor.u32 %v1531_v17, %v1530_v35  ;;  %v1535_v61 = vor.u32 %v1534_v56, %v1533_v50  ;;  %v1538_v21 = vor.u32 %v1537_v9, %v1536_v16  ;;  %v1542_v37 = vshll.u32 %v4829_v26, %v1527_v57  ;;  %2713 = vmatprep.mubr.bf16.mxu1 %v2867_v45 }
 0x194   : > { %v1541_v4 = vor.u32 %v1540_v14, %v1539_v25  ;;  %v1543_v27 = vshrl.u32 %v4830_v39, %v1528_v42  ;;  %v1497_v13 = vsel %vm3971_vm6, %v3775_v43, %v1494_v6  ;;  %v1394_v15 = vsel %vm4073_vm14, 0, %v1392_v47 }
 0x195   : > { %v4848_v38 = vand.u32 2147483647, %v3838_v59  ;;  %v4118_v35 = vsub.s32 %v1677_v51, %v1680_v58  ;;  %v1561_v50 = vshll.u32 %v1521_v36, 8  ;;  %v1388_v17 = vmul.f32 %v1387_v5, %v1385_v24 }
 0x196   : > { %v1703_v57 = vsub.s32 4, %v1679_v46  ;;  %v1544_v56 = vor.u32 %v1543_v27, %v1542_v37  ;;  %vm1545_vm7 = vcmp.lt.s32.totalorder %v4092_v29, 1  ;;  %vm1548_vm6 = vcmp.lt.s32.totalorder %v4092_v29, 4 }
 0x197   : > { %vm4114_vm1 = vcmp.le.f32.partialorder %v4848_v38, 0.7853982  ;;  %v1683_v8 = vsub.s32 0, %v4118_v35  ;;  %v1553_v6 = vsel %vm1545_vm7, %v1532_v10, %v1535_v61  ;;  %vm1546_vm2 = vcmp.lt.s32.totalorder %v4092_v29, 2 }
 0x198   : > { %vm1547_vm11 = vcmp.lt.s32.totalorder %v4092_v29, 3  ;;  %v1550_v51 = vsel %vm1548_vm6, %v1538_v21, 2102212464  ;;  %v1554_v47 = vsel %vm1548_vm6, %v1541_v4, 920167782  ;;  %v1529_v27 = vshrl.u32 %v4818_v48, %v1528_v42 }
 0x199   : > { %v2641_v36 = vmin.u32 %v1683_v8, %v4118_v35  ;;  %v1555_v16 = vsel %vm1547_vm11, %v1538_v21, %v1554_v47  ;;  %v1557_v24 = vsel %vm1545_vm7, %v1535_v61, %v1538_v21  ;;  %v1389_v9 = vxor.u32 2147483648, %v1388_v17 }
 0x19a   : > { %v1704_v25 = vsel %vm1619_vm4, %v1703_v57, %v1679_v46  ;;  %v1556_v14 = vsel %vm1546_vm2, %v1553_v6, %v1555_v16  ;;  %v1558_v5 = vsel %vm1548_vm6, %v1544_v56, 1326507024  ;;  %v1549_v37 = vsel %vm1545_vm7, %v1529_v27, %v1532_v10  ;;  %v440_v56 = vpop.permute.xlu0 %439 }
 0x19b   : > { %v1685_v58 = vclz %v2641_v36  ;;  %v1551_v38 = vsel %vm1547_vm11, %v1535_v61, %v1550_v51  ;;  %v1559_v8 = vsel %vm1547_vm11, %v1541_v4, %v1558_v5  ;;  %v1828_v21 = vand.u32 2139095040, %v4090_v33 }
 0x19c   : > { %v1560_v42 = vsel %vm1546_vm2, %v1557_v24, %v1559_v8  ;;  %v4140_v47 = vmul.u32.u64.low %v1561_v50, %v1556_v14  ;;  %v4141_v43 = vmul.u32.u64.high %v1561_v50, %v1556_v14, %v4140_v47  ;;  %v4144_v31 = vadd.s32 3, %v1394_v15 }
 0x19d   : > { %v2642_v46 = vadd.s32 4294967294, %v1685_v58  ;;  %v4146_v57 = vmul.u32.u64.low %v1561_v50, %v1560_v42  ;;  %v4147_v6 = vmul.u32.u64.high %v1561_v50, %v1560_v42, %v4146_v57  ;;  %2906 = vcosq.f32 %v1497_v13 }
 0x19e   : > { %4851 = vst [vmem:[#allocation23_spill] sm:$0xff] %v4144_v31  ;;  %v1390_v10 = vsel %vm1307_vm8, %v1389_v9, %v1388_v17  ;;  %v1706_v4 = vsel %vm4114_vm1, 0, %v1704_v25  ;;  %v1829_v61 = vshrl.u32 %v1828_v21, 23  ;;  %2908 = vsinq.f32 %v1497_v13  ;;  %v332_v8 = vpop.permute.xlu0 %331 }
 0x19f   : > { %v1673_v51 = vadd.s32 %v4045_v20, %v4054_v32  ;;  %vm2643_vm15 = vcmp.lt.s32.totalorder %v2642_v46, 0  ;;  %v1552_v15 = vsel %vm1546_vm2, %v1549_v37, %v1551_v38  ;;  %v1571_v27 = vadd.s32 1, %v4141_v43 }
 0x1a0   : > { %v1688_v36 = vsel %vm2643_vm15, 0, %v2642_v46  ;;  %v2648_v16 = vadd.s32 4294967169, %v1829_v61  ;;  %v4852_v24 = vand.u32 2147483647, %v4090_v33  ;;  %v1393_v17 = vsel %vm4073_vm14, %v3778_v49, %v1390_v10 }
 0x1a1   : > { %v1689_v9 = vsub.s32 32, %v1688_v36  ;;  %v1693_v13 = vsub.s32 4294967266, %v1688_v36  ;;  %v4163_v25 = vadd.s32 3, %v1706_v4  ;;  %v1568_v20 = vmul.u32 %v1561_v50, %v1552_v15 }
 0x1a2   : > { %v1832_v14 = vand.u32 8388607, %v4852_v24  ;;  %vm1570_vm3 = vc.u32 %v4147_v6, %v4140_v47  ;;  %v1835_v32 = vadd.s32 1, %v2648_v16  ;;  %v4167_v29 = vadd.f32 %v440_v56, %v4079_v23 }
 0x1a3   : > { %4853 = vst [vmem:[#allocation24_spill] sm:$0xff] %v4163_v25  ;;  %v1690_v38 = vshll.u32 %v4118_v35, %v1688_v36  ;;  %v1691_v5 = vshrl.u32 %v1673_v51, %v1689_v9  ;;  %v1694_v58 = vadd.s32 127, %v1693_v13  ;;  %v1572_v37 = vsel %vm1570_vm3, %v1571_v27, %v4141_v43 }
 0x1a4   : > { %2910 = vcosq.f32 %v1393_v17  ;;  %v1573_v42 = vadd.s32 %v1572_v37, %v1568_v20  ;;  %v1833_v21 = vor.u32 8388608, %v1832_v14  ;;  %vm1836_vm0 = vcmp.gt.s32.totalorder %v1835_v32, 0 }
 0x1a5   : > { %2912 = vsinq.f32 %v1393_v17  ;;  %v1692_v50 = vor.u32 %v1691_v5, %v1690_v38  ;;  %v1695_v46 = vshll.u32 %v1694_v58, 23  ;;  %v1837_v57 = vsel %vm1836_vm0, %v1835_v32, 0 }
 0x1a6   : > { %vm1515_vm8 = vcmp.lt.s32.totalorder %v4008_v22, 0  ;;  %v1574_v23 = vadd.s32 536870912, %v1573_v42  ;;  %v1839_v56 = vand.u32 31, %v1837_v57  ;;  %v4173_v35 = vmul.f32 %v3732_v2, %v332_v8 }
 0x1a7   : > { %v4176_v10 = vadd.f32 %v455_v54, %v4083_v18  ;;  %v1696_v43 = vor.u32 4788187, %v1695_v46  ;;  %v4179_v4 = vadd.s32 %v4140_v47, %v4147_v6  ;;  %v4185_v15 = vpop.eup %2906  ;;  %v4187_v16 = vshll.u32 %v1833_v21, 8 }
 0x1a8   : > { %4854 = vst [vmem:[#allocation25_spill] sm:$0xff] %v4185_v15  ;;  %v1575_v36 = vshrl.u32 %v1574_v23, 30  ;;  %v1840_v27 = vsub.s32 32, %v1839_v56  ;;  %v1724_v2 = vand.u32 2139095040, %v4167_v29  ;;  %v4190_v18 = vpop.eup %2908  ;;  %v1699_v14 = vcvt.s32.f32 %v1692_v50 }
 0x1a9   : > { %4855 = vst [vmem:[#allocation26_spill] sm:$0xff] %v4190_v18  ;;  %v1697_v24 = vand.u32 2147483647, %v1696_v43  ;;  %v1838_v47 = vshrl.u32 %v1837_v57, 5  ;;  %v1842_v6 = vshll.u32 %v4818_v48, %v1839_v56  ;;  %v1845_v13 = vshll.u32 %v4823_v55, %v1839_v56 }
 0x1aa   : > { %v1576_v17 = vshll.u32 %v1575_v36, 30  ;;  %v1843_v9 = vshrl.u32 %v4823_v55, %v1840_v27  ;;  %v1848_v20 = vshll.u32 %v4828_v52, %v1839_v56  ;;  %v1599_v32 = vsub.s32 4, %v1575_v36 }
 0x1ab   : > { %v1846_v38 = vshrl.u32 %v4828_v52, %v1840_v27  ;;  %v1849_v5 = vshrl.u32 %v4825_v30, %v1840_v27  ;;  %v1852_v58 = vshrl.u32 %v4829_v26, %v1840_v27  ;;  %v1700_v37 = vmul.f32 %v1699_v14, %v1697_v24 }
 0x1ac   : > { %v4199_v8 = vsub.s32 %v1573_v42, %v1576_v17  ;;  %v1851_v54 = vshll.u32 %v4825_v30, %v1839_v56  ;;  %v1855_v21 = vshrl.u32 %v4830_v39, %v1840_v27  ;;  %v1844_v50 = vor.u32 %v1843_v9, %v1842_v6 }
 0x1ad   : > { %v1847_v46 = vor.u32 %v1846_v38, %v1845_v13  ;;  %v1850_v57 = vor.u32 %v1849_v5, %v1848_v20  ;;  %v1854_v23 = vshll.u32 %v4829_v26, %v1839_v56  ;;  %v4857_v51 = vand.u32 2147483647, %v4008_v22 }
 0x1ae   : > { %v4204_v43 = vpop.eup %2910  ;;  %v1579_v42 = vsub.s32 0, %v4199_v8  ;;  %v1853_v24 = vor.u32 %v1852_v58, %v1851_v54  ;;  %v4860_v14 = vand.u32 2147483647, %v4167_v29  ;;  %v1600_v56 = vsel %vm1515_vm8, %v1599_v32, %v1575_v36 }
 0x1af   : > { %4856 = vst [vmem:[#allocation27_spill] sm:$0xff] %v4204_v43  ;;  %vm4208_vm5 = vcmp.le.f32.partialorder %v4857_v51, 0.7853982  ;;  %v4218_v9 = vpop.eup %2912  ;;  %v1841_v13 = vshrl.u32 %v4818_v48, %v1840_v27  ;;  %v1856_v51 = vor.u32 %v1855_v21, %v1854_v23  ;;  %v1725_v20 = vshrl.u32 %v1724_v2, 23 }
 0x1b0   : > { %v4215_v17 = vand.u32 8388607, %v4860_v14  ;;  %4861 = vst [vmem:[#allocation28_spill] sm:$0xff] %v4218_v9  ;;  %v1701_v38 = vxor.u32 2147483648, %v1700_v37  ;;  %v2637_v5 = vmin.u32 %v1579_v42, %v4199_v8  ;;  %vm1857_vm9 = vcmp.lt.s32.totalorder %v1838_v47, 1 }
 0x1b1   : > { %vm1860_vm12 = vcmp.lt.s32.totalorder %v1838_v47, 4  ;;  %vm1859_vm14 = vcmp.lt.s32.totalorder %v1838_v47, 3  ;;  %v1865_v54 = vsel %vm1857_vm9, %v1844_v50, %v1847_v46  ;;  %vm1858_vm7 = vcmp.lt.s32.totalorder %v1838_v47, 2 }
 0x1b2   : > { %v1862_v58 = vsel %vm1860_vm12, %v1850_v57, 2102212464  ;;  %v1866_v14 = vsel %vm1860_vm12, %v1853_v24, 920167782  ;;  %v1581_v25 = vclz %v2637_v5  ;;  %v1861_v6 = vsel %vm1857_vm9, %v1841_v13, %v1844_v50 }
 0x1b3   : > { %v1867_v15 = vsel %vm1859_vm14, %v1850_v57, %v1866_v14  ;;  %v1863_v18 = vsel %vm1859_vm14, %v1847_v46, %v1862_v58  ;;  %v1869_v36 = vsel %vm1857_vm9, %v1847_v46, %v1850_v57  ;;  %v1870_v32 = vsel %vm1860_vm12, %v1856_v51, 1326507024 }
 0x1b4   : > { %v1868_v43 = vsel %vm1858_vm7, %v1865_v54, %v1867_v15  ;;  %v2638_v27 = vadd.s32 4294967294, %v1581_v25  ;;  %v1871_v21 = vsel %vm1859_vm14, %v1853_v24, %v1870_v32  ;;  %v1702_v42 = vsel %vm1619_vm4, %v1701_v38, %v1700_v37 }
 0x1b5   : > { %v4225_v2 = vmul.u32.u64.low %v4187_v16, %v1868_v43  ;;  %v4226_v23 = vmul.u32.u64.high %v4187_v16, %v1868_v43, %v4225_v2  ;;  %v1872_v9 = vsel %vm1858_vm7, %v1869_v36, %v1871_v21  ;;  %v2644_v31 = vadd.s32 4294967169, %v1725_v20 }
 0x1b6   : > { %v1729_v5 = vor.u32 8388608, %v4215_v17  ;;  %vm2639_vm6 = vcmp.lt.s32.totalorder %v2638_v27, 0  ;;  %v1864_v47 = vsel %vm1858_vm7, %v1861_v6, %v1863_v18  ;;  %v1602_v25 = vsel %vm4208_vm5, 0, %v1600_v56 }
 0x1b7   : > { %v4232_v50 = vmul.u32.u64.low %v4187_v16, %v1872_v9  ;;  %v4233_v15 = vmul.u32.u64.high %v4187_v16, %v1872_v9, %v4232_v50  ;;  %v1584_v46 = vsel %vm2639_vm6, 0, %v2638_v27  ;;  %v1731_v57 = vadd.s32 1, %v2644_v31  ;;  %v2866_v31 = vld [vmem:[%s4752_s3] sm:$0xff]  }
 0x1b8   : > { %v2036_v43 = vand.u32 2139095040, %v4176_v10  ;;  %v1705_v37 = vsel %vm4114_vm1, %v3838_v59, %v1702_v42  ;;  %v1585_v24 = vsub.s32 32, %v1584_v46  ;;  %v1589_v13 = vsub.s32 4294967266, %v1584_v46  ;;  %2705 = vmatprep.mubr.bf16.mxu0 %v2866_v31 }
 0x1b9   : > { %v1883_v17 = vadd.s32 1, %v4226_v23  ;;  %v1586_v18 = vshll.u32 %v4199_v8, %v1584_v46  ;;  %v1880_v6 = vmul.u32 %v4187_v16, %v1864_v47  ;;  %vm1732_vm4 = vcmp.gt.s32.totalorder %v1731_v57, 0  ;;  %v450_v16 = vpop.permute.xlu0 %449 }
 0x1ba   : > { %v4862_v9 = vand.u32 2147483647, %v4176_v10  ;;  %v1587_v56 = vshrl.u32 %v4179_v4, %v1585_v24  ;;  %v1590_v20 = vadd.s32 127, %v1589_v13  ;;  %vm1882_vm1 = vc.u32 %v4233_v15, %v4225_v2 }
 0x1bb   : > { %v2037_v8 = vshrl.u32 %v2036_v43, 23  ;;  %2914 = vcosq.f32 %v1705_v37  ;;  %v4256_v38 = vadd.s32 3, %v1602_v25  ;;  %v1884_v58 = vsel %vm1882_vm1, %v1883_v17, %v4226_v23 }
 0x1bc   : > { %v4246_v51 = vand.u32 8388607, %v4862_v9  ;;  %v1733_v54 = vsel %vm1732_vm4, %v1731_v57, 0  ;;  %2916 = vsinq.f32 %v1705_v37  ;;  %v1588_v14 = vor.u32 %v1587_v56, %v1586_v18 }
 0x1bd   : > { %v1591_v36 = vshll.u32 %v1590_v20, 23  ;;  %vm1827_vm2 = vcmp.lt.s32.totalorder %v4090_v33, 0  ;;  %v1885_v32 = vadd.s32 %v1884_v58, %v1880_v6  ;;  %v1735_v4 = vand.u32 31, %v1733_v54 }
 0x1be   : > { %v4260_v27 = vshll.u32 %v1729_v5, 8  ;;  %v4264_v42 = vadd.f32 %v450_v16, %v4173_v35  ;;  %v4267_v23 = vadd.s32 %v4225_v2, %v4233_v15  ;;  %v2656_v46 = vadd.s32 4294967169, %v2037_v8 }
 0x1bf   : > { %v1592_v47 = vor.u32 4788187, %v1591_v36  ;;  %v1886_v50 = vadd.s32 536870912, %v1885_v32  ;;  %v1595_v25 = vcvt.s32.f32 %v1588_v14  ;;  %v4863_v57 = vand.u32 2147483647, %v4090_v33 }
 0x1c0   : > { %v1734_v5 = vshrl.u32 %v1733_v54, 5  ;;  %v1736_v37 = vsub.s32 32, %v1735_v4  ;;  %v1738_v24 = vshll.u32 %v4818_v48, %v1735_v4  ;;  %v1741_v17 = vshll.u32 %v4823_v55, %v1735_v4 }
 0x1c1   : > { %vm4271_vm11 = vcmp.le.f32.partialorder %v4863_v57, 0.7853982  ;;  %v1593_v13 = vand.u32 2147483647, %v1592_v47  ;;  %v1887_v35 = vshrl.u32 %v1886_v50, 30  ;;  %v1744_v2 = vshll.u32 %v4828_v52, %v1735_v4 }
 0x1c2   : > { %v1739_v15 = vshrl.u32 %v4823_v55, %v1736_v37  ;;  %v1742_v18 = vshrl.u32 %v4828_v52, %v1736_v37  ;;  %v1745_v6 = vshrl.u32 %v4825_v30, %v1736_v37  ;;  %v1747_v9 = vshll.u32 %v4825_v30, %v1735_v4 }
 0x1c3   : > { %v1596_v31 = vmul.f32 %v1595_v25, %v1593_v13  ;;  %v1888_v45 = vshll.u32 %v1887_v35, 30  ;;  %v1911_v56 = vsub.s32 4, %v1887_v35  ;;  %v1748_v20 = vshrl.u32 %v4829_v26, %v1736_v37 }
 0x1c4   : > { %v1740_v8 = vor.u32 %v1739_v15, %v1738_v24  ;;  %v1743_v16 = vor.u32 %v1742_v18, %v1741_v17  ;;  %v1746_v58 = vor.u32 %v1745_v6, %v1744_v2  ;;  %v1751_v54 = vshrl.u32 %v4830_v39, %v1736_v37 }
 0x1c5   : > { %v1597_v14 = vxor.u32 2147483648, %v1596_v31  ;;  %v4284_v36 = vsub.s32 %v1885_v32, %v1888_v45  ;;  %v1749_v47 = vor.u32 %v1748_v20, %v1747_v9  ;;  %v1750_v50 = vshll.u32 %v4829_v26, %v1735_v4  ;;  %v4287_v57 = vpop.eup %2914 }
 0x1c6   : > { %v1912_v25 = vsel %vm1827_vm2, %v1911_v56, %v1887_v35  ;;  %v1737_v13 = vshrl.u32 %v4818_v48, %v1736_v37  ;;  %vm1753_vm15 = vcmp.lt.s32.totalorder %v1734_v5, 1  ;;  %v2043_v21 = vadd.s32 1, %v2656_v46  ;;  %v4292_v24 = vpop.eup %2916 }
 0x1c7   : > { %v1598_v17 = vsel %vm1515_vm8, %v1597_v14, %v1596_v31  ;;  %v1891_v32 = vsub.s32 0, %v4284_v36  ;;  %v1752_v2 = vor.u32 %v1751_v54, %v1750_v50  ;;  %vm1756_vm3 = vcmp.lt.s32.totalorder %v1734_v5, 4 }
 0x1c8   : > { %vm1755_vm0 = vcmp.lt.s32.totalorder %v1734_v5, 3  ;;  %v1757_v4 = vsel %vm1753_vm15, %v1737_v13, %v1740_v8  ;;  %v1758_v15 = vsel %vm1756_vm3, %v1746_v58, 2102212464  ;;  %v1761_v35 = vsel %vm1753_vm15, %v1740_v8, %v1743_v16 }
 0x1c9   : > { %v2649_v37 = vmin.u32 %v1891_v32, %v4284_v36  ;;  %v1914_v46 = vsel %vm4271_vm11, 0, %v1912_v25  ;;  %v1759_v18 = vsel %vm1755_vm0, %v1743_v16, %v1758_v15  ;;  %v1762_v6 = vsel %vm1756_vm3, %v1749_v47, 920167782 }
 0x1ca   : > { %v4308_v9 = vsel %vm4208_vm5, %v4008_v22, %v1598_v17  ;;  %vm1754_vm8 = vcmp.lt.s32.totalorder %v1734_v5, 2  ;;  %v1763_v31 = vsel %vm1755_vm0, %v1746_v58, %v1762_v6  ;;  %v1765_v45 = vsel %vm1753_vm15, %v1743_v16, %v1746_v58 }
 0x1cb   : > { %v1893_v56 = vclz %v2649_v37  ;;  %v1760_v20 = vsel %vm1754_vm8, %v1757_v4, %v1759_v18  ;;  %v1764_v8 = vsel %vm1754_vm8, %v1761_v35, %v1763_v31  ;;  %v1766_v54 = vsel %vm1756_vm3, %v1752_v2, 1326507024 }
 0x1cc   : > { %v1767_v14 = vsel %vm1755_vm0, %v1749_v47, %v1766_v54  ;;  %v4315_v50 = vmul.u32.u64.low %v4260_v27, %v1764_v8  ;;  %v4316_v25 = vmul.u32.u64.high %v4260_v27, %v1764_v8, %v4315_v50  ;;  %vm2044_vm9 = vcmp.gt.s32.totalorder %v2043_v21, 0 }
 0x1cd   : > { %v2650_v61 = vadd.s32 4294967294, %v1893_v56  ;;  %v1768_v13 = vsel %vm1754_vm8, %v1765_v45, %v1767_v14  ;;  %v2045_v17 = vsel %vm2044_vm9, %v2043_v21, 0  ;;  %v4866_v32 = vor.u32 8388608, %v4246_v51 }
 0x1ce   : > { %v4324_v16 = vmul.u32.u64.low %v4260_v27, %v1768_v13  ;;  %v4325_v58 = vmul.u32.u64.high %v4260_v27, %v1768_v13, %v4324_v16  ;;  %v2047_v2 = vand.u32 31, %v2045_v17  ;;  %2918 = vcosq.f32 %v4308_v9 }
 0x1cf   : > { %v4321_v15 = vshll.u32 %v4866_v32, 8  ;;  %vm2651_vm5 = vcmp.lt.s32.totalorder %v2650_v61, 0  ;;  %v4329_v47 = vadd.s32 3, %v1914_v46  ;;  %v1776_v4 = vmul.u32 %v4260_v27, %v1760_v20 }
 0x1d0   : > { %v1896_v35 = vsel %vm2651_vm5, 0, %v2650_v61  ;;  %v1779_v21 = vadd.s32 1, %v4316_v25  ;;  %v4333_v51 = vshrl.u32 %v2045_v17, 5  ;;  %v2048_v37 = vsub.s32 32, %v2047_v2 }
 0x1d1   : > { %4867 = vst [vmem:[#allocation29_spill] sm:$0xff] %v4329_v47  ;;  %v1897_v18 = vsub.s32 32, %v1896_v35  ;;  %v1901_v6 = vsub.s32 4294967266, %v1896_v35  ;;  %v2050_v31 = vshll.u32 %v4818_v48, %v2047_v2  ;;  %v1898_v56 = vshll.u32 %v4284_v36, %v1896_v35 }
 0x1d2   : > { %vm1778_vm12 = vc.u32 %v4325_v58, %v4315_v50  ;;  %v2051_v46 = vshrl.u32 %v4823_v55, %v2048_v37  ;;  %v2053_v27 = vshll.u32 %v4823_v55, %v2047_v2  ;;  %vm1723_vm14 = vcmp.lt.s32.totalorder %v4167_v29, 0 }
 0x1d3   : > { %v1899_v20 = vshrl.u32 %v4267_v23, %v1897_v18  ;;  %v1902_v8 = vadd.s32 127, %v1901_v6  ;;  %v1780_v54 = vsel %vm1778_vm12, %v1779_v21, %v4316_v25  ;;  %v2054_v14 = vshrl.u32 %v4828_v52, %v2048_v37 }
 0x1d4   : > { %v1781_v61 = vadd.s32 %v1780_v54, %v1776_v4  ;;  %v2049_v13 = vshrl.u32 %v4818_v48, %v2048_v37  ;;  %v2056_v36 = vshll.u32 %v4828_v52, %v2047_v2  ;;  %v2057_v17 = vshrl.u32 %v4825_v30, %v2048_v37 }
 0x1d5   : > { %v1900_v32 = vor.u32 %v1899_v20, %v1898_v56  ;;  %v1903_v16 = vshll.u32 %v1902_v8, 23  ;;  %v2052_v35 = vor.u32 %v2051_v46, %v2050_v31  ;;  %v2055_v45 = vor.u32 %v2054_v14, %v2053_v27 }
 0x1d6   : > { %v4868_v23 = vand.u32 2147483647, %v4167_v29  ;;  %v1782_v25 = vadd.s32 536870912, %v1781_v61  ;;  %v2058_v21 = vor.u32 %v2057_v17, %v2056_v36  ;;  %v2059_v4 = vshll.u32 %v4825_v30, %v2047_v2 }
 0x1d7   : > { %v2060_v6 = vshrl.u32 %v4829_v26, %v2048_v37  ;;  %v1904_v54 = vor.u32 4788187, %v1903_v16  ;;  %v1907_v5 = vcvt.s32.f32 %v1900_v32  ;;  %v2062_v47 = vshll.u32 %v4829_v26, %v2047_v2 }
 0x1d8   : > { %vm4351_vm7 = vcmp.le.f32.partialorder %v4868_v23, 0.7853982  ;;  %v2063_v56 = vshrl.u32 %v4830_v39, %v2048_v37  ;;  %v1783_v31 = vshrl.u32 %v1782_v25, 30  ;;  %vm2065_vm6 = vcmp.lt.s32.totalorder %v4333_v51, 1  ;;  %v4361_v27 = vpop.eup %2918 }
 0x1d9   : > { %v2061_v46 = vor.u32 %v2060_v6, %v2059_v4  ;;  %vm2066_vm4 = vcmp.lt.s32.totalorder %v4333_v51, 2  ;;  %v1905_v20 = vand.u32 2147483647, %v1904_v54  ;;  %vm2067_vm1 = vcmp.lt.s32.totalorder %v4333_v51, 3 }
 0x1da   : > { %v2064_v8 = vor.u32 %v2063_v56, %v2062_v47  ;;  %vm2068_vm15 = vcmp.lt.s32.totalorder %v4333_v51, 4  ;;  %v1784_v14 = vshll.u32 %v1783_v31, 30  ;;  %v1807_v36 = vsub.s32 4, %v1783_v31 }
 0x1db   : > { %v2070_v17 = vsel %vm2068_vm15, %v2058_v21, 2102212464  ;;  %v2073_v2 = vsel %vm2065_vm6, %v2052_v35, %v2055_v45  ;;  %v1908_v37 = vmul.f32 %v1907_v5, %v1905_v20  ;;  %v2069_v32 = vsel %vm2065_vm6, %v2049_v13, %v2052_v35 }
 0x1dc   : > { %v2071_v16 = vsel %vm2067_vm1, %v2055_v45, %v2070_v17  ;;  %v2074_v23 = vsel %vm2068_vm15, %v2061_v46, 920167782  ;;  %v4371_v25 = vsub.s32 %v1781_v61, %v1784_v14  ;;  %v1808_v47 = vsel %vm1723_vm14, %v1807_v36, %v1783_v31 }
 0x1dd   : > { %v2075_v4 = vsel %vm2067_vm1, %v2058_v21, %v2074_v23  ;;  %v2077_v6 = vsel %vm2065_vm6, %v2055_v45, %v2058_v21  ;;  %v1909_v54 = vxor.u32 2147483648, %v1908_v37  ;;  %v2078_v13 = vsel %vm2068_vm15, %v2064_v8, 1326507024 }
 0x1de   : > { %v2076_v5 = vsel %vm2066_vm4, %v2073_v2, %v2075_v4  ;;  %v4871_v35 = vsel %vm3433_vm10, 0, %v3475_v28  ;;  %v1787_v56 = vsub.s32 0, %v4371_v25  ;;  %v2072_v31 = vsel %vm2066_vm4, %v2069_v32, %v2071_v16 }
 0x1df   : > { %v566_v61 = vadd.s32 3, %v4871_v35  ;;  %v2079_v20 = vsel %vm2067_vm1, %v2061_v46, %v2078_v13  ;;  %v4872_v45 = vand.u32 2147483647, %v4264_v42  ;;  %v1810_v14 = vsel %vm4351_vm7, 0, %v1808_v47 }
 0x1e0   : > { %v2080_v7 = vsel %vm2066_vm4, %v2077_v6, %v2079_v20  ;;  %v4397_v28 = vmul.u32.u64.low %v4321_v15, %v2076_v5  ;;  %v4398_v8 = vmul.u32.u64.high %v4321_v15, %v2076_v5, %v4397_v28  ;;  %v1910_v36 = vsel %vm1827_vm2, %v1909_v54, %v1908_v37 }
 0x1e1   : > { %v1936_v21 = vand.u32 8388607, %v4872_v45  ;;  %v2645_v17 = vmin.u32 %v1787_v56, %v4371_v25  ;;  %v4404_v46 = vmul.u32.u64.low %v4321_v15, %v2080_v7  ;;  %v4405_v2 = vmul.u32.u64.high %v4321_v15, %v2080_v7, %v4404_v46 }
 0x1e2   : > { %2920 = vsinq.f32 %v4308_v9  ;;  %v1777_v32 = vadd.s32 %v4315_v50, %v4325_v58  ;;  %v4873_v51 = vand.u32 2139095040, %v4264_v42  ;;  %v567_v23 = vand.u32 3, %v566_v61 }
 0x1e3   : > { %v1789_v47 = vclz %v2645_v17  ;;  %v4412_v4 = vadd.s32 3, %v1810_v14  ;;  %vm565_vm10 = vweird.f32 %v3248_v53  ;;  %v570_v37 = vxor.u32 2147483648, %v3539_v63 }
 0x1e4   : > { %v1933_v16 = vshrl.u32 %v4873_v51, 23  ;;  %v573_v6 = vxor.u32 2147483648, %v3533_v0  ;;  %v1913_v9 = vsel %vm4271_vm11, %v4090_v33, %v1910_v36  ;;  %v2088_v54 = vmul.u32 %v4321_v15, %v2072_v31 }
 0x1e5   : > { %v2091_v50 = vadd.s32 1, %v4398_v8  ;;  %v2646_v5 = vadd.s32 4294967294, %v1789_v47  ;;  %vm2090_vm2 = vc.u32 %v4405_v2, %v4397_v28  ;;  %v1937_v13 = vor.u32 8388608, %v1936_v21 }
 0x1e6   : > { %v2652_v58 = vadd.s32 4294967169, %v1933_v16  ;;  %vm569_vm3 = vcmp.eq.s32.totalorder %v567_v23, 0  ;;  %vm572_vm0 = vcmp.eq.s32.totalorder %v567_v23, 2  ;;  %v666_v15 = vsel %vm3450_vm13, 0, %v3486_v41 }
 0x1e7   : > { %v2092_v35 = vsel %vm2090_vm2, %v2091_v50, %v4398_v8  ;;  %v571_v56 = vsel %vm569_vm3, %v3533_v0, %v570_v37  ;;  %vm2647_vm8 = vcmp.lt.s32.totalorder %v2646_v5, 0  ;;  %v574_v43 = vsel %vm572_vm0, %v573_v6, %v3539_v63 }
 0x1e8   : > { %v1939_v61 = vadd.s32 1, %v2652_v58  ;;  %v2093_v20 = vadd.s32 %v2092_v35, %v2088_v54  ;;  %2922 = vcosq.f32 %v1913_v9  ;;  %v1792_v31 = vsel %vm2647_vm8, 0, %v2646_v5 }
 0x1e9   : > { %vm2035_vm11 = vcmp.lt.s32.totalorder %v4176_v10, 0  ;;  %vm568_vm5 = vcmp.lt.s32.totalorder %v567_v23, 2  ;;  %v1793_v45 = vsub.s32 32, %v1792_v31  ;;  %v1797_v21 = vsub.s32 4294967266, %v1792_v31 }
 0x1ea   : > { %vm1940_vm9 = vcmp.gt.s32.totalorder %v1939_v61, 0  ;;  %v2094_v14 = vadd.s32 536870912, %v2093_v20  ;;  %v575_v7 = vsel %vm568_vm5, %v571_v56, %v574_v43  ;;  %2924 = vsinq.f32 %v1913_v9 }
 0x1eb   : > { %v1941_v0 = vsel %vm1940_vm9, %v1939_v61, 0  ;;  %v4430_v8 = vshll.u32 %v1937_v13, 8  ;;  %v670_v36 = vadd.s32 3, %v666_v15  ;;  %v1794_v63 = vshll.u32 %v4371_v25, %v1792_v31 }
 0x1ec   : > { %v1795_v17 = vshrl.u32 %v1777_v32, %v1793_v45  ;;  %v1798_v44 = vadd.s32 127, %v1797_v21  ;;  %v2095_v41 = vshrl.u32 %v2094_v14, 30  ;;  %v4433_v46 = vpop.eup %2920  ;;  %v4436_v51 = vadd.s32 %v4397_v28, %v4405_v2 }
 0x1ed   : > { %v1943_v16 = vand.u32 31, %v1941_v0  ;;  %v4440_v23 = vsel %vm565_vm10, nan, %v575_v7  ;;  %v674_v47 = vxor.u32 2147483648, %v3670_v62  ;;  %v1942_v25 = vshrl.u32 %v1941_v0, 5 }
 0x1ee   : > { %v1796_v37 = vor.u32 %v1795_v17, %v1794_v63  ;;  %v1799_v6 = vshll.u32 %v1798_v44, 23  ;;  %v2096_v9 = vshll.u32 %v2095_v41, 30  ;;  %v2119_v54 = vsub.s32 4, %v2095_v41 }
 0x1ef   : > { %v1944_v32 = vsub.s32 32, %v1943_v16  ;;  %v4443_v50 = vand.u32 3, %v670_v36  ;;  %v677_v58 = vxor.u32 2147483648, %v3663_v40  ;;  %v1946_v2 = vshll.u32 %v4818_v48, %v1943_v16 }
 0x1f0   : > { %v1800_v5 = vor.u32 4788187, %v1799_v6  ;;  %v4446_v28 = vsub.s32 %v2093_v20, %v2096_v9  ;;  %v1949_v53 = vshll.u32 %v4823_v55, %v1943_v16  ;;  %v1803_v13 = vcvt.s32.f32 %v1796_v37 }
 0x1f1   : > { %v4874_v35 = vand.u32 2147483647, %v4176_v10  ;;  %v1947_v56 = vshrl.u32 %v4823_v55, %v1944_v32  ;;  %v1950_v43 = vshrl.u32 %v4828_v52, %v1944_v32  ;;  %v1952_v15 = vshll.u32 %v4828_v52, %v1943_v16 }
 0x1f2   : > { %v1801_v31 = vand.u32 2147483647, %v1800_v5  ;;  %v2099_v20 = vsub.s32 0, %v4446_v28  ;;  %v4462_v45 = vsel %vm2035_vm11, %v2119_v54, %v2095_v41  ;;  %v1953_v21 = vshrl.u32 %v4825_v30, %v1944_v32  ;;  %v4465_v14 = vpop.eup %2922 }
 0x1f3   : > { %vm4452_vm13 = vcmp.le.f32.partialorder %v4874_v35, 0.7853982  ;;  %v1948_v7 = vor.u32 %v1947_v56, %v1946_v2  ;;  %v1951_v0 = vor.u32 %v1950_v43, %v1949_v53  ;;  %v1955_v36 = vshll.u32 %v4825_v30, %v1943_v16 }
 0x1f4   : > { %v1956_v55 = vshrl.u32 %v4829_v26, %v1944_v32  ;;  %v1804_v63 = vmul.f32 %v1803_v13, %v1801_v31  ;;  %v2657_v52 = vmin.u32 %v2099_v20, %v4446_v28  ;;  %v1945_v17 = vshrl.u32 %v4818_v48, %v1944_v32  ;;  %v4471_v37 = vpop.eup %2924 }
 0x1f5   : > { %v1954_v44 = vor.u32 %v1953_v21, %v1952_v15  ;;  %v1958_v6 = vshll.u32 %v4829_v26, %v1943_v16  ;;  %v1959_v9 = vshrl.u32 %v4830_v39, %v1944_v32  ;;  %vm1961_vm12 = vcmp.lt.s32.totalorder %v1942_v25, 1 }
 0x1f6   : > { %v1957_v41 = vor.u32 %v1956_v55, %v1955_v36  ;;  %v1805_v54 = vxor.u32 2147483648, %v1804_v63  ;;  %v2101_v5 = vclz %v2657_v52  ;;  %vm1963_vm6 = vcmp.lt.s32.totalorder %v1942_v25, 3 }
 0x1f7   : > { %vm1964_vm4 = vcmp.lt.s32.totalorder %v1942_v25, 4  ;;  %v1960_v30 = vor.u32 %v1959_v9, %v1958_v6  ;;  %v1965_v2 = vsel %vm1961_vm12, %v1945_v17, %v1948_v7  ;;  %v1969_v48 = vsel %vm1961_vm12, %v1948_v7, %v1951_v0 }
 0x1f8   : > { %v1966_v53 = vsel %vm1964_vm4, %v1954_v44, 2102212464  ;;  %v1806_v13 = vsel %vm1723_vm14, %v1805_v54, %v1804_v63  ;;  %v2658_v35 = vadd.s32 4294967294, %v2101_v5  ;;  %v1970_v39 = vsel %vm1964_vm4, %v1957_v41, 920167782 }
 0x1f9   : > { %v1967_v26 = vsel %vm1963_vm6, %v1951_v0, %v1966_v53  ;;  %v1809_v16 = vsel %vm4351_vm7, %v4167_v29, %v1806_v13  ;;  %vm1962_vm1 = vcmp.lt.s32.totalorder %v1942_v25, 2  ;;  %v1971_v32 = vsel %vm1963_vm6, %v1954_v44, %v1970_v39 }
 0x1fa   : > { %v1973_v56 = vsel %vm1961_vm12, %v1951_v0, %v1954_v44  ;;  %vm669_vm15 = vweird.f32 %v3253_v60  ;;  %vm2659_vm10 = vcmp.lt.s32.totalorder %v2658_v35, 0  ;;  %v2122_v43 = vsel %vm4452_vm13, 0, %v4462_v45 }
 0x1fb   : > { %v1972_v15 = vsel %vm1962_vm1, %v1969_v48, %v1971_v32  ;;  %v1974_v31 = vsel %vm1964_vm4, %v1960_v30, 1326507024  ;;  %2926 = vcosq.f32 %v1809_v16  ;;  %v2104_v20 = vsel %vm2659_vm10, 0, %v2658_v35  ;;  %v4877_v30 = vld [vmem:[#allocation11_spill] sm:$0xff] }
 0x1fc   : > { %v1968_v21 = vsel %vm1962_vm1, %v1965_v2, %v1967_v26  ;;  %v1975_v18 = vsel %vm1963_vm6, %v1957_v41, %v1974_v31  ;;  %v2105_v7 = vsub.s32 32, %v2104_v20  ;;  %v2106_v36 = vshll.u32 %v4446_v28, %v2104_v20  ;;  %v4882_v31 = vld [vmem:[#allocation9_spill] sm:$0xff] }
 0x1fd   : > { %v2109_v55 = vsub.s32 4294967266, %v2104_v20  ;;  %v1976_v0 = vsel %vm1962_vm1, %v1973_v56, %v1975_v18  ;;  %v4499_v17 = vmul.u32.u64.low %v4430_v8, %v1972_v15  ;;  %v4500_v44 = vmul.u32.u64.high %v4430_v8, %v1972_v15, %v4499_v17  ;;  %v4881_v56 = vld [vmem:[#allocation7_spill] sm:$0xff] }
 0x1fe   : > { %v4495_v63 = vmul.u32.u64.low %v4430_v8, %v1976_v0  ;;  %v4496_v52 = vmul.u32.u64.high %v4430_v8, %v1976_v0, %v4495_v63  ;;  %v2107_v6 = vshrl.u32 %v4436_v51, %v2105_v7  ;;  %vm672_vm14 = vcmp.lt.s32.totalorder %v4443_v50, 2 }
 0x1ff   : > { %v2110_v9 = vadd.s32 127, %v2109_v55  ;;  %vm673_vm7 = vcmp.eq.s32.totalorder %v4443_v50, 0  ;;  %vm773_vm2 = vweird.f32 %v3337_v3  ;;  %vm676_vm3 = vcmp.eq.s32.totalorder %v4443_v50, 2 }
 0x200   : > { %v675_v25 = vsel %vm673_vm7, %v3663_v40, %v674_v47  ;;  %v775_v28 = vand.u32 3, %v3646_v19  ;;  %v778_v41 = vxor.u32 2147483648, %v3755_v11  ;;  %v2108_v54 = vor.u32 %v2107_v6, %v2106_v36 }
 0x201   : > { %v2111_v5 = vshll.u32 %v2110_v9, 23  ;;  %v678_v51 = vsel %vm676_vm3, %v677_v58, %v3670_v62  ;;  %v781_v2 = vxor.u32 2147483648, %v4877_v30  ;;  %v1984_v53 = vmul.u32 %v4430_v8, %v1968_v21  ;;  %v4885_v9 = vld [vmem:[#allocation13_spill] sm:$0xff] }
 0x202   : > { %vm1986_vm0 = vc.u32 %v4496_v52, %v4499_v17  ;;  %v1987_v47 = vadd.s32 1, %v4500_v44  ;;  %v679_v19 = vsel %vm672_vm14, %v675_v25, %v678_v51  ;;  %v2115_v13 = vcvt.s32.f32 %v2108_v54 }
 0x203   : > { %v2112_v48 = vor.u32 4788187, %v2111_v5  ;;  %v680_v35 = vsel %vm669_vm15, nan, %v679_v19  ;;  %vm776_vm8 = vcmp.lt.s32.totalorder %v775_v28, 2  ;;  %vm1931_vm9 = vcmp.lt.s32.totalorder %v4264_v42, 0 }
 0x204   : > { %v1988_v40 = vsel %vm1986_vm0, %v1987_v47, %v4500_v44  ;;  %v2153_v62 = vpack.c.bf16 %v680_v35, %v4440_v23  ;;  %vm777_vm5 = vcmp.eq.s32.totalorder %v775_v28, 0  ;;  %vm780_vm12 = vcmp.eq.s32.totalorder %v775_v28, 2  ;;  %v4887_v35 = vld [vmem:[#allocation5_spill] sm:$0xff] }
 0x205   : > { %v2113_v8 = vand.u32 2147483647, %v2112_v48  ;;  %v1989_v58 = vadd.s32 %v1988_v40, %v1984_v53  ;;  %v779_v26 = vsel %vm777_vm5, %v4877_v30, %v778_v41  ;;  %v782_v50 = vsel %vm780_vm12, %v781_v2, %v3755_v11  ;;  %v4530_v39 = vpop.eup %2926  ;;  %v4883_v11 = vld [vmem:[#allocation3_spill] sm:$0xff]  ;;  %v4886_v41 = vld [vmem:[#allocation16_spill] sm:$0xff] }
 0x206   : > { %2928 = vsinq.f32 %v1809_v16  ;;  %v4878_v60 = vand.u32 2147483647, %v4264_v42  ;;  %2689 = vmatprep.subr.bf16.mxu0 %v2153_v62  ;;  %2721 = vmatprep.subr.bf16.mxu1 %v2153_v62  ;;  %v783_v23 = vsel %vm776_vm8, %v779_v26, %v782_v50  ;;  %v879_v15 = vand.u32 3, %v4881_v56  ;;  %v4884_v16 = vld [vmem:[#allocation8_spill] sm:$0xff]  ;;  %v4891_v56 = vld [vmem:[#allocation14_spill] sm:$0xff] }
 0x207   : > { %v882_v20 = vxor.u32 2147483648, %v4882_v31  ;;  %v2116_v21 = vmul.f32 %v2115_v13, %v2113_v8  ;;  %v1990_v18 = vadd.s32 536870912, %v1989_v58  ;;  %2690 = vmatpush3.bf16.msra.mxu0 %v2153_v62  ;;  %2729 = vmatpush3.bf16.msra.mxu1 %v2153_v62  ;;  %vm877_vm4 = vweird.f32 %v4883_v11  ;;  %v4888_v62 = vld [vmem:[#allocation10_spill] sm:$0xff]  ;;  %v4889_v50 = vld [vmem:[#allocation4_spill] sm:$0xff] }
 0x208   : > { %vm4534_vm6 = vcmp.le.f32.partialorder %v4878_v60, 0.7853982  ;;  %v885_v7 = vxor.u32 2147483648, %v4884_v16  ;;  %v784_v36 = vsel %vm773_vm2, nan, %v783_v23  ;;  %vm880_vm1 = vcmp.lt.s32.totalorder %v879_v15, 2  ;;  %v4890_v60 = vld [vmem:[#allocation15_spill] sm:$0xff] }
 0x209   : > { %vm881_vm15 = vcmp.eq.s32.totalorder %v879_v15, 0  ;;  %vm884_vm10 = vcmp.eq.s32.totalorder %v879_v15, 2  ;;  %v2117_v55 = vxor.u32 2147483648, %v2116_v21  ;;  %v1991_v0 = vshrl.u32 %v1990_v18, 30  ;;  %v4892_v18 = vld [vmem:[#allocation22_spill] sm:$0xff] }
 0x20a   : > { %v883_v63 = vsel %vm881_vm15, %v4884_v16, %v882_v20  ;;  %v886_v44 = vsel %vm884_vm10, %v885_v7, %v4882_v31  ;;  %v983_v25 = vand.u32 3, %v4885_v9  ;;  %v986_v28 = vxor.u32 2147483648, %v4014_v1 }
 0x20b   : > { %v887_v6 = vsel %vm880_vm1, %v883_v63, %v886_v44  ;;  %v989_v54 = vxor.u32 2147483648, %v4886_v41  ;;  %v2118_v3 = vsel %vm2035_vm11, %v2117_v55, %v2116_v21  ;;  %v1992_v5 = vshll.u32 %v1991_v0, 30 }
 0x20c   : > { %v2015_v51 = vsub.s32 4, %v1991_v0  ;;  %v888_v30 = vsel %vm877_vm4, nan, %v887_v6  ;;  %v2121_v2 = vsel %vm4452_vm13, %v4176_v10, %v2118_v3  ;;  %v4558_v53 = vadd.s32 %v4499_v17, %v4496_v52 }
 0x20d   : > { %v2154_v47 = vpack.c.bf16 %v888_v30, %v784_v36  ;;  %vm985_vm14 = vcmp.eq.s32.totalorder %v983_v25, 0  ;;  %2930 = vcosq.f32 %v2121_v2  ;;  %v4560_v19 = vsub.s32 %v1989_v58, %v1992_v5  ;;  %v4893_v36 = vld [vmem:[#allocation21_spill] sm:$0xff]  ;;  %v4896_v30 = vld [vmem:[#allocation6_spill] sm:$0xff] }
 0x20e   : > { %v4564_v48 = vsel %vm1931_vm9, %v2015_v51, %v1991_v0  ;;  %v987_v13 = vsel %vm985_vm14, %v4886_v41, %v986_v28  ;;  %2932 = vsinq.f32 %v2121_v2  ;;  %vm981_vm11 = vweird.f32 %v4887_v35  ;;  %v4894_v28 = vld [vmem:[#allocation17_spill] sm:$0xff]  ;;  %v4897_v2 = vld [vmem:[#allocation19_spill] sm:$0xff] }
 0x20f   : > { %2691 = vmatprep.subr.bf16.mxu0 %v2154_v47  ;;  %2722 = vmatprep.subr.bf16.mxu1 %v2154_v47  ;;  %vm984_vm7 = vcmp.lt.s32.totalorder %v983_v25, 2  ;;  %vm988_vm2 = vcmp.eq.s32.totalorder %v983_v25, 2  ;;  %v1995_v52 = vsub.s32 0, %v4560_v19  ;;  %v2018_v17 = vsel %vm4534_vm6, 0, %v4564_v48 }
 0x210   : > { %2692 = vmatpush3.bf16.msra.mxu0 %v2154_v47  ;;  %2730 = vmatpush3.bf16.msra.mxu1 %v2154_v47  ;;  %v990_v40 = vsel %vm988_vm2, %v989_v54, %v4014_v1  ;;  %v1087_v8 = vand.u32 3, %v4888_v62  ;;  %v4574_v58 = vpop.eup %2928  ;;  %vm1085_vm3 = vweird.f32 %v4889_v50  ;;  %v1090_v23 = vxor.u32 2147483648, %v4890_v60  ;;  %v4895_v54 = vld [vmem:[#allocation20_spill] sm:$0xff] }
 0x211   : > { %v991_v26 = vsel %vm984_vm7, %v987_v13, %v990_v40  ;;  %v1093_v15 = vxor.u32 2147483648, %v4891_v56  ;;  %v2653_v31 = vmin.u32 %v1995_v52, %v4560_v19  ;;  %vm1189_vm8 = vweird.f32 %v3661_v34  ;;  %v4899_v50 = vld [vmem:[#allocation28_spill] sm:$0xff] }
 0x212   : > { %v992_v20 = vsel %vm981_vm11, nan, %v991_v26  ;;  %vm1089_vm0 = vcmp.eq.s32.totalorder %v1087_v8, 0  ;;  %vm1092_vm5 = vcmp.eq.s32.totalorder %v1087_v8, 2  ;;  %v1191_v1 = vand.u32 3, %v3991_v12 }
 0x213   : > { %v1091_v21 = vsel %vm1089_vm0, %v4891_v56, %v1090_v23  ;;  %v1194_v11 = vxor.u32 2147483648, %v4892_v18  ;;  %v1997_v16 = vclz %v2653_v31  ;;  %vm1088_vm12 = vcmp.lt.s32.totalorder %v1087_v8, 2  ;;  %v4898_v8 = vld [vmem:[#allocation23_spill] sm:$0xff] }
 0x214   : > { %v1094_v7 = vsel %vm1092_vm5, %v1093_v15, %v4890_v60  ;;  %v1197_v55 = vxor.u32 2147483648, %v4893_v36  ;;  %vm1192_vm4 = vcmp.lt.s32.totalorder %v1191_v1, 2  ;;  %vm1193_vm1 = vcmp.eq.s32.totalorder %v1191_v1, 0  ;;  %v4900_v23 = vld [vmem:[#allocation27_spill] sm:$0xff] }
 0x215   : > { %v1095_v0 = vsel %vm1088_vm12, %v1091_v21, %v1094_v7  ;;  %vm1196_vm15 = vcmp.eq.s32.totalorder %v1191_v1, 2  ;;  %v2654_v63 = vadd.s32 4294967294, %v1997_v16  ;;  %v1195_v6 = vsel %vm1193_vm1, %v4893_v36, %v1194_v11 }
 0x216   : > { %v1096_v44 = vsel %vm1085_vm3, nan, %v1095_v0  ;;  %v1198_v12 = vsel %vm1196_vm15, %v1197_v55, %v4892_v18  ;;  %v1295_v41 = vand.u32 3, %v4894_v28  ;;  %v1298_v3 = vxor.u32 2147483648, %v4895_v54  ;;  %v4901_v55 = vld [vmem:[#allocation18_spill] sm:$0xff] }
 0x217   : > { %v2155_v9 = vpack.c.bf16 %v1096_v44, %v992_v20  ;;  %v1199_v25 = vsel %vm1192_vm4, %v1195_v6, %v1198_v12  ;;  %v4592_v5 = vpop.eup %2930  ;;  %vm2655_vm10 = vcmp.lt.s32.totalorder %v2654_v63, 0  ;;  %vm1293_vm14 = vweird.f32 %v4896_v30  ;;  %v4902_v0 = vld [vmem:[#allocation26_spill] sm:$0xff] }
 0x218   : > { %v1200_v51 = vsel %vm1189_vm8, nan, %v1199_v25  ;;  %v1301_v47 = vxor.u32 2147483648, %v4897_v2  ;;  %v4598_v13 = vpop.eup %2932  ;;  %v2000_v35 = vsel %vm2655_vm10, 0, %v2654_v63  ;;  %vm1296_vm11 = vcmp.lt.s32.totalorder %v1295_v41, 2  ;;  %v4903_v63 = vld [vmem:[#allocation25_spill] sm:$0xff]  ;;  %v4904_v25 = vld [vmem:[#allocation12_spill] sm:$0xff] }
 0x219   : > { %2693 = vmatprep.subr.bf16.mxu0 %v2155_v9  ;;  %2723 = vmatprep.subr.bf16.mxu1 %v2155_v9  ;;  %vm1297_vm7 = vcmp.eq.s32.totalorder %v1295_v41, 0  ;;  %vm1397_vm2 = vweird.f32 %v3778_v49  ;;  %v2001_v52 = vsub.s32 32, %v2000_v35  ;;  %v2005_v40 = vsub.s32 4294967266, %v2000_v35 }
 0x21a   : > { %2694 = vmatpush3.bf16.msra.mxu0 %v2155_v9  ;;  %2731 = vmatpush3.bf16.msra.mxu1 %v2155_v9  ;;  %v1299_v34 = vsel %vm1297_vm7, %v4897_v2, %v1298_v3  ;;  %vm1300_vm3 = vcmp.eq.s32.totalorder %v1295_v41, 2  ;;  %v1399_v26 = vand.u32 3, %v4898_v8  ;;  %v1402_v60 = vxor.u32 2147483648, %v4899_v50 }
 0x21b   : > { %v1302_v62 = vsel %vm1300_vm3, %v1301_v47, %v4895_v54  ;;  %v1405_v56 = vxor.u32 2147483648, %v4900_v23  ;;  %v2002_v15 = vshll.u32 %v4560_v19, %v2000_v35  ;;  %v2003_v31 = vshrl.u32 %v4558_v53, %v2001_v52 }
 0x21c   : > { %v2006_v20 = vadd.s32 127, %v2005_v40  ;;  %v1303_v21 = vsel %vm1296_vm11, %v1299_v34, %v1302_v62  ;;  %vm1400_vm0 = vcmp.lt.s32.totalorder %v1399_v26, 2  ;;  %vm1401_vm8 = vcmp.eq.s32.totalorder %v1399_v26, 0  ;;  %v4905_v34 = vld [vmem:[#allocation24_spill] sm:$0xff] }
 0x21d   : > { %v1304_v1 = vsel %vm1293_vm14, nan, %v1303_v21  ;;  %vm1404_vm5 = vcmp.eq.s32.totalorder %v1399_v26, 2  ;;  %v2004_v18 = vor.u32 %v2003_v31, %v2002_v15  ;;  %v1403_v7 = vsel %vm1401_vm8, %v4900_v23, %v1402_v60 }
 0x21e   : > { %v2007_v11 = vshll.u32 %v2006_v20, 23  ;;  %v2156_v16 = vpack.c.bf16 %v1304_v1, %v1200_v51  ;;  %v1406_v36 = vsel %vm1404_vm5, %v1405_v56, %v4899_v50  ;;  %v1503_v19 = vand.u32 3, %v4901_v55 }
 0x21f   : > { %v1506_v53 = vxor.u32 2147483648, %v4902_v0  ;;  %v1509_v44 = vxor.u32 2147483648, %v4903_v63  ;;  %v2011_v12 = vcvt.s32.f32 %v2004_v18  ;;  %v1407_v9 = vsel %vm1400_vm0, %v1403_v7, %v1406_v36  ;;  %v4906_v18 = vld [vmem:[#allocation29_spill] sm:$0xff] }
 0x220   : > { %v2008_v6 = vor.u32 4788187, %v2007_v11  ;;  %2695 = vmatprep.subr.bf16.mxu0 %v2156_v16  ;;  %2724 = vmatprep.subr.bf16.mxu1 %v2156_v16  ;;  %vm1501_vm12 = vweird.f32 %v4904_v25  ;;  %v1408_v28 = vsel %vm1397_vm2, nan, %v1407_v9  ;;  %vm1504_vm4 = vcmp.lt.s32.totalorder %v1503_v19, 2 }
 0x221   : > { %2696 = vmatpush3.bf16.msra.mxu0 %v2156_v16  ;;  %2732 = vmatpush3.bf16.msra.mxu1 %v2156_v16  ;;  %vm1505_vm1 = vcmp.eq.s32.totalorder %v1503_v19, 0  ;;  %vm1508_vm15 = vcmp.eq.s32.totalorder %v1503_v19, 2  ;;  %v1607_v51 = vand.u32 3, %v4256_v38  ;;  %vm1605_vm10 = vweird.f32 %v4008_v22 }
 0x222   : > { %v2009_v41 = vand.u32 2147483647, %v2008_v6  ;;  %v1507_v54 = vsel %vm1505_vm1, %v4903_v63, %v1506_v53  ;;  %v1510_v3 = vsel %vm1508_vm15, %v1509_v44, %v4902_v0  ;;  %v1610_v2 = vxor.u32 2147483648, %v4433_v46 }
 0x223   : > { %v1511_v30 = vsel %vm1504_vm4, %v1507_v54, %v1510_v3  ;;  %v1613_v47 = vxor.u32 2147483648, %v4361_v27  ;;  %vm1608_vm14 = vcmp.lt.s32.totalorder %v1607_v51, 2  ;;  %vm1609_vm11 = vcmp.eq.s32.totalorder %v1607_v51, 0  ;;  %v2872_v54 = vld [vmem:[%s4752_s3 + $0x18] sm:$0xff]  }
 0x224   : > { %v2012_v35 = vmul.f32 %v2011_v12, %v2009_v41  ;;  %v1512_v49 = vsel %vm1501_vm12, nan, %v1511_v30  ;;  %v1611_v40 = vsel %vm1609_vm11, %v4361_v27, %v1610_v2  ;;  %vm1612_vm7 = vcmp.eq.s32.totalorder %v1607_v51, 2  ;;  %v2869_v41 = vld [vmem:[%s4752_s3 + $0x28] sm:$0xff]   ;;  %v2873_v3 = vld [vmem:[%s4752_s3 + $0x38] sm:$0xff]   ;;  %v2185_v51 = vpop.permute.xlu1 %2184  ;;  %v2180_v30 = vpop.permute.xlu0 %2179 }
 0x225   : > { %v2157_v52 = vpack.c.bf16 %v1512_v49, %v1408_v28  ;;  %v1711_v62 = vand.u32 3, %v4905_v34  ;;  %v1614_v8 = vsel %vm1612_vm7, %v1613_v47, %v4433_v46  ;;  %v1714_v26 = vxor.u32 2147483648, %v4292_v24 }
 0x226   : > { %v2013_v38 = vxor.u32 2147483648, %v2012_v35  ;;  %v1717_v50 = vxor.u32 2147483648, %v4287_v57  ;;  %v1615_v60 = vsel %vm1608_vm14, %v1611_v40, %v1614_v8  ;;  %vm1709_vm8 = vweird.f32 %v3838_v59 }
 0x227   : > { %2697 = vmatprep.subr.bf16.mxu0 %v2157_v52  ;;  %2725 = vmatprep.subr.bf16.mxu1 %v2157_v52  ;;  %vm1712_vm2 = vcmp.lt.s32.totalorder %v1711_v62, 2  ;;  %vm1713_vm3 = vcmp.eq.s32.totalorder %v1711_v62, 0  ;;  %vm1716_vm0 = vcmp.eq.s32.totalorder %v1711_v62, 2  ;;  %v1616_v27 = vsel %vm1605_vm10, nan, %v1615_v60 }
 0x228   : > { %v2014_v23 = vsel %vm1931_vm9, %v2013_v38, %v2012_v35  ;;  %2698 = vmatpush3.bf16.msra.mxu0 %v2157_v52  ;;  %2733 = vmatpush3.bf16.msra.mxu1 %v2157_v52  ;;  %v1715_v46 = vsel %vm1713_vm3, %v4287_v57, %v1714_v26  ;;  %v1718_v56 = vsel %vm1716_vm0, %v1717_v50, %v4292_v24  ;;  %v1815_v20 = vand.u32 3, %v4412_v4  ;;  %v2195_v2 = vpop.permute.xlu1 %2194  ;;  %v2190_v47 = vpop.permute.xlu0 %2189 }
 0x229   : > { %v2017_v15 = vsel %vm4534_vm6, %v4264_v42, %v2014_v23  ;;  %v1719_v31 = vsel %vm1712_vm2, %v1715_v46, %v1718_v56  ;;  %v1818_v1 = vxor.u32 2147483648, %v4574_v58  ;;  %v1821_v22 = vxor.u32 2147483648, %v4530_v39 }
 0x22a   : > { %2934 = vcosq.f32 %v2017_v15  ;;  %v1720_v21 = vsel %vm1709_vm8, nan, %v1719_v31  ;;  %v2126_v57 = vadd.s32 3, %v2122_v43  ;;  %vm1817_vm9 = vcmp.eq.s32.totalorder %v1815_v20, 0 }
 0x22b   : > { %2936 = vsinq.f32 %v2017_v15  ;;  %v2158_v24 = vpack.c.bf16 %v1720_v21, %v1616_v27  ;;  %v2022_v59 = vadd.s32 3, %v2018_v17  ;;  %v1819_v4 = vsel %vm1817_vm9, %v4530_v39, %v1818_v1 }
 0x22c   : > { %vm1820_vm5 = vcmp.eq.s32.totalorder %v1815_v20, 2  ;;  %v1919_v11 = vand.u32 3, %v4906_v18  ;;  %vm1816_vm12 = vcmp.lt.s32.totalorder %v1815_v20, 2  ;;  %v1922_v45 = vxor.u32 2147483648, %v4471_v37  ;;  %v2205_v35 = vpop.permute.xlu1 %2204  ;;  %v2200_v49 = vpop.permute.xlu0 %2199 }
 0x22d   : > { %2699 = vmatprep.subr.bf16.mxu0 %v2158_v24  ;;  %2726 = vmatprep.subr.bf16.mxu1 %v2158_v24  ;;  %v1822_v61 = vsel %vm1820_vm5, %v1821_v22, %v4574_v58  ;;  %v1925_v43 = vxor.u32 2147483648, %v4465_v14  ;;  %vm1813_vm13 = vweird.f32 %v4167_v29  ;;  %vm1917_vm15 = vweird.f32 %v4090_v33 }
 0x22e   : > { %2700 = vmatpush3.bf16.msra.mxu0 %v2158_v24  ;;  %2734 = vmatpush3.bf16.msra.mxu1 %v2158_v24  ;;  %v1823_v32 = vsel %vm1816_vm12, %v1819_v4, %v1822_v61  ;;  %vm1921_vm6 = vcmp.eq.s32.totalorder %v1919_v11, 0  ;;  %vm1924_vm4 = vcmp.eq.s32.totalorder %v1919_v11, 2  ;;  %vm1920_vm1 = vcmp.lt.s32.totalorder %v1919_v11, 2 }
 0x22f   : > { %v1824_v39 = vsel %vm1813_vm13, nan, %v1823_v32  ;;  %v1923_v48 = vsel %vm1921_vm6, %v4465_v14, %v1922_v45  ;;  %v1926_v17 = vsel %vm1924_vm4, %v1925_v43, %v4471_v37  ;;  %v2127_v16 = vand.u32 3, %v2126_v57 }
 0x230   : > { %v1927_v58 = vsel %vm1920_vm1, %v1923_v48, %v1926_v17  ;;  %v2130_v7 = vxor.u32 2147483648, %v4598_v13  ;;  %v2023_v19 = vand.u32 3, %v2022_v59  ;;  %v2133_v0 = vxor.u32 2147483648, %v4592_v5  ;;  %v2215_v52 = vpop.permute.xlu1 %2214  ;;  %v2210_v40 = vpop.permute.xlu0 %2209 }
 0x231   : > { %v1928_v36 = vsel %vm1917_vm15, nan, %v1927_v58  ;;  %vm2129_vm10 = vcmp.eq.s32.totalorder %v2127_v16, 0  ;;  %vm2132_vm14 = vcmp.eq.s32.totalorder %v2127_v16, 2  ;;  %vm2128_vm11 = vcmp.lt.s32.totalorder %v2127_v16, 2 }
 0x232   : > { %v2159_v55 = vpack.c.bf16 %v1928_v36, %v1824_v39  ;;  %v2131_v29 = vsel %vm2129_vm10, %v4592_v5, %v2130_v7  ;;  %v2134_v37 = vsel %vm2132_vm14, %v2133_v0, %v4598_v13  ;;  %vm2028_vm7 = vcmp.eq.s32.totalorder %v2023_v19, 2  ;;  %v2868_v13 = vld [vmem:[%s4752_s3 + $0x8] sm:$0xff]  }
 0x233   : > { %v2135_v44 = vsel %vm2128_vm11, %v2131_v29, %v2134_v37  ;;  %vm2025_vm2 = vcmp.eq.s32.totalorder %v2023_v19, 0  ;;  %vm2125_vm3 = vweird.f32 %v4176_v10  ;;  %vm2024_vm0 = vcmp.lt.s32.totalorder %v2023_v19, 2  ;;  %v2870_v10 = vld [vmem:[%s4752_s3 + $0x10] sm:$0xff]  }
 0x234   : > { %v2935_v53 = vpop.eup %2934  ;;  %2701 = vmatprep.subr.bf16.mxu0 %v2159_v55  ;;  %2727 = vmatprep.subr.bf16.mxu1 %v2159_v55  ;;  %v2136_v12 = vsel %vm2125_vm3, nan, %v2135_v44  ;;  %vm2021_vm8 = vweird.f32 %v4264_v42  ;;  %v2871_v42 = vld [vmem:[%s4752_s3 + $0x30] sm:$0xff]   ;;  %v2225_v34 = vpop.permute.xlu1 %2224 }
 0x235   : > { %v2937_v14 = vpop.eup %2936  ;;  %2702 = vmatpush3.bf16.msra.mxu0 %v2159_v55  ;;  %2735 = vmatpush3.bf16.msra.mxu1 %v2159_v55  ;;  %v2029_v33 = vxor.u32 2147483648, %v2935_v53  ;;  %v2220_v62 = vpop.permute.xlu0 %2219 }
 0x236   : > { %v2026_v63 = vxor.u32 2147483648, %v2937_v14 }
 0x237   : > { %v2030_v6 = vsel %vm2028_vm7, %v2029_v33, %v2937_v14 }
 0x238   : > { %v2027_v5 = vsel %vm2025_vm2, %v2935_v53, %v2026_v63  ;;  %v2235_v38 = vpop.permute.xlu1 %2234 }
 0x239   : > { %v2031_v9 = vsel %vm2024_vm0, %v2027_v5, %v2030_v6  ;;  %v2230_v8 = vpop.permute.xlu0 %2229 }
 0x23a   : > { %v2032_v25 = vsel %vm2021_vm8, nan, %v2031_v9 }
 0x23b   : > { %v2160_v28 = vpack.c.bf16 %v2136_v12, %v2032_v25 }
 0x23c   : > { %v2245_v26 = vpop.permute.xlu1 %2244 }
 0x23d   : > { %2703 = vmatprep.subr.bf16.mxu0 %v2160_v28  ;;  %2728 = vmatprep.subr.bf16.mxu1 %v2160_v28  ;;  %v2240_v50 = vpop.permute.xlu0 %2239 }
 0x23e   : > { %2704 = vmatpush3.bf16.msra.mxu0 %v2160_v28  ;;  %2736 = vmatpush3.bf16.msra.mxu1 %v2160_v28 }
 0x240   : > { %v2255_v11 = vpop.permute.xlu1 %2254 }
 0x241   : > { %2706 = vmatmul.mubr.bf16.vlgmr.msra.gmra.mrb[0].mxu0 %v2868_v13  ;;  %2714 = vmatmul.mubr.bf16.vlgmr.msra.gmra.mrb[0].mxu1 %v2869_v41  ;;  %v2250_v61 = vpop.permute.xlu0 %2249 }
 0x242   : > { %2709 = vmatprep.mubr.bf16.mxu0 %v2870_v10  ;;  %2717 = vmatprep.mubr.bf16.mxu1 %v2871_v42 }
 0x249   : > { %2710 = vmatmul.mubr.bf16.gmra.mrb[4].mxu0 %v2872_v54  ;;  %2718 = vmatmul.mubr.bf16.gmra.mrb[4].mxu1 %v2873_v3 }
 0x314   : > { %v2707_v60 = vpop.f32.mrb[0].mxu0  ;;  %v2715_v23 = vpop.f32.mrb[0].mxu1 }
 0x315   : > { %v2348_v27 = vadd.f32 %v2707_v60, %v2190_v47  ;;  %v2380_v46 = vadd.f32 %v2715_v23, %v2230_v8  ;;  %v2339_v56 = vpop.f32.mrb[1].mxu0  ;;  %v2371_v15 = vpop.f32.mrb[1].mxu1 }
 0x316   : > { %v2340_v31 = vadd.f32 %v2339_v56, %v2180_v30  ;;  %v2372_v20 = vadd.f32 %v2371_v15, %v2220_v62  ;;  %v2708_v21 = vpop.f32.mrb[2].mxu0  ;;  %v2716_v1 = vpop.f32.mrb[2].mxu1 }
 0x317   : > { %2404 = vst [vmem:[%s4687_s27 + $0x10] sm:$0xff] %v2348_v27  ;;  %2412 = vst [vmem:[%s4687_s27 + $0x50] sm:$0xff] %v2380_v46  ;;  %v2351_v22 = vadd.f32 %v2708_v21, %v2195_v2  ;;  %v2383_v57 = vadd.f32 %v2716_v1, %v2235_v38  ;;  %v2342_v24 = vpop.f32.mrb[3].mxu0  ;;  %v2374_v59 = vpop.f32.mrb[3].mxu1 }
 0x318   : > { %2402 = vst [vmem:[%s4687_s27] sm:$0xff] %v2340_v31  ;;  %2410 = vst [vmem:[%s4687_s27 + $0x40] sm:$0xff] %v2372_v20  ;;  %v2343_v4 = vadd.f32 %v2342_v24, %v2185_v51  ;;  %v2375_v18 = vadd.f32 %v2374_v59, %v2225_v34 }
 0x319   : > { %2405 = vst [vmem:[%s4687_s27 + $0x18] sm:$0xff] %v2351_v22  ;;  %2413 = vst [vmem:[%s4687_s27 + $0x58] sm:$0xff] %v2383_v57 }
 0x31a   : > { %2403 = vst [vmem:[%s4687_s27 + $0x8] sm:$0xff] %v2343_v4  ;;  %2411 = vst [vmem:[%s4687_s27 + $0x48] sm:$0xff] %v2375_v18 }
 0x31c   : > { %v2711_v45 = vpop.f32.mrb[4].mxu0  ;;  %v2719_v43 = vpop.f32.mrb[4].mxu1  ;;  %2424 = sbr.rel (!%p3078_p5) target bundleno = 812 (0x32c), region = 44 }
 0x31d   : > { %v2364_v32 = vadd.f32 %v2711_v45, %v2210_v40  ;;  %v2396_v39 = vadd.f32 %v2719_v43, %v2250_v61  ;;  %v2355_v48 = vpop.f32.mrb[5].mxu0  ;;  %v2387_v17 = vpop.f32.mrb[5].mxu1 }
 0x31e   : > { %v2356_v58 = vadd.f32 %v2355_v48, %v2200_v49  ;;  %v2388_v16 = vadd.f32 %v2387_v17, %v2240_v50  ;;  %v2712_v7 = vpop.f32.mrb[6].mxu0  ;;  %v2720_v36 = vpop.f32.mrb[6].mxu1  ;;  %v2490_v63 = vld [vmem:[%s4687_s27 + $0x10] sm:$0xff] (%p3078_p5) }
 0x31f   : > { %2408 = vst [vmem:[%s4687_s27 + $0x30] sm:$0xff] %v2364_v32  ;;  %2416 = vst [vmem:[%s4687_s27 + $0x70] sm:$0xff] %v2396_v39  ;;  %v2367_v55 = vadd.f32 %v2712_v7, %v2215_v52  ;;  %v2399_v19 = vadd.f32 %v2720_v36, %v2255_v11  ;;  %v2358_v29 = vpop.f32.mrb[7].mxu0  ;;  %v2390_v0 = vpop.f32.mrb[7].mxu1  ;;  %v2486_v33 = vld [vmem:[%s4687_s27] sm:$0xff] (%p3078_p5)  ;;  %v2506_v13 = vld [vmem:[%s4687_s27 + $0x50] sm:$0xff] (%p3078_p5) }
 0x320   : > { %2406 = vst [vmem:[%s4687_s27 + $0x20] sm:$0xff] %v2356_v58  ;;  %2414 = vst [vmem:[%s4687_s27 + $0x60] sm:$0xff] %v2388_v16  ;;  %v2359_v53 = vadd.f32 %v2358_v29, %v2205_v35  ;;  %v2391_v14 = vadd.f32 %v2390_v0, %v2245_v26  ;;  %v2492_v44 = vld [vmem:[%s4687_s27 + $0x18] sm:$0xff] (%p3078_p5)  ;;  %v2502_v25 = vld [vmem:[%s4687_s27 + $0x40] sm:$0xff] (%p3078_p5) }
 0x321   : > { %2409 = vst [vmem:[%s4687_s27 + $0x38] sm:$0xff] %v2367_v55  ;;  %2417 = vst [vmem:[%s4687_s27 + $0x78] sm:$0xff] %v2399_v19  ;;  %v2488_v37 = vld [vmem:[%s4687_s27 + $0x8] sm:$0xff] (%p3078_p5)  ;;  %v2508_v41 = vld [vmem:[%s4687_s27 + $0x58] sm:$0xff] (%p3078_p5) }
 0x322   : > { %2407 = vst [vmem:[%s4687_s27 + $0x28] sm:$0xff] %v2359_v53  ;;  %2415 = vst [vmem:[%s4687_s27 + $0x68] sm:$0xff] %v2391_v14  ;;  %v2504_v28 = vld [vmem:[%s4687_s27 + $0x48] sm:$0xff] (%p3078_p5) }
 0x323   : > { %2487 = vst [vmem:[%s2428_s7] sm:$0xff] %v2486_v33  ;;  %2489 = vst [vmem:[%s2428_s7 + $0x10] sm:$0xff] %v2488_v37 }
 0x324   : > { %2491 = vst [vmem:[%s2428_s7 + $0x20] sm:$0xff] %v2490_v63  ;;  %2493 = vst [vmem:[%s2428_s7 + $0x30] sm:$0xff] %v2492_v44 }
 0x325   : > { %2503 = vst [vmem:[%s2428_s7 + $0x80] sm:$0xff] %v2502_v25  ;;  %2505 = vst [vmem:[%s2428_s7 + $0x90] sm:$0xff] %v2504_v28 }
 0x326   : > { %v2498_v12 = vld [vmem:[%s4687_s27 + $0x30] sm:$0xff]  ;;  %2507 = vst [vmem:[%s2428_s7 + $0xa0] sm:$0xff] %v2506_v13  ;;  %2509 = vst [vmem:[%s2428_s7 + $0xb0] sm:$0xff] %v2508_v41 }
 0x327   : > { %v2494_v6 = vld [vmem:[%s4687_s27 + $0x20] sm:$0xff]  ;;  %2499 = vst [vmem:[%s2428_s7 + $0x60] sm:$0xff] %v2498_v12  ;;  %v2514_v54 = vld [vmem:[%s4687_s27 + $0x70] sm:$0xff] }
 0x328   : > { %v2500_v9 = vld [vmem:[%s4687_s27 + $0x38] sm:$0xff]  ;;  %2495 = vst [vmem:[%s2428_s7 + $0x40] sm:$0xff] %v2494_v6  ;;  %v2510_v10 = vld [vmem:[%s4687_s27 + $0x60] sm:$0xff]  ;;  %2515 = vst [vmem:[%s2428_s7 + $0xe0] sm:$0xff] %v2514_v54 }
 0x329   : > { %v2496_v5 = vld [vmem:[%s4687_s27 + $0x28] sm:$0xff]  ;;  %2501 = vst [vmem:[%s2428_s7 + $0x70] sm:$0xff] %v2500_v9  ;;  %2511 = vst [vmem:[%s2428_s7 + $0xc0] sm:$0xff] %v2510_v10  ;;  %v2516_v3 = vld [vmem:[%s4687_s27 + $0x78] sm:$0xff] }
 0x32a   : > { %2497 = vst [vmem:[%s2428_s7 + $0x50] sm:$0xff] %v2496_v5  ;;  %v2512_v42 = vld [vmem:[%s4687_s27 + $0x68] sm:$0xff]  ;;  %2517 = vst [vmem:[%s2428_s7 + $0xf0] sm:$0xff] %v2516_v3 }
 0x32b   : > { %2513 = vst [vmem:[%s2428_s7 + $0xd0] sm:$0xff] %v2512_v42 }
 0x32c PF: > { %s15_s24 = sadd.s32 1, %s2993_s24   ;;  %s4907_s18 = smov %s2973_s19 }
 0x32d   : > { %p12_p11 = scmp.ge.s32.totalorder %s15_s24, 6   ;;  %s4908_s19 = smov %s3089_s8 }
 0x32e   : > { %s4909_s20 = smov %s2985_s22  ;;  %s4910_s21 = smov %s2989_s23 }
 0x32f   : > { %s4911_s22 = smov %s4914_s25  ;;  %s4912_s23 = smov %s4918_s26 }
 0x330   :  { %14 = sbr.rel (!%p12_p11) target bundleno = 4 (0x4), region = 108 }

</bundles_post_ra>
